<compile_context>
chip_gen: v5e
topology: v5e:2x2
jax: 0.10.0
libtpu: 0.0.40
codegen_flags: <defaults>
</compile_context>

<pallas_src>
import functools

import jax
import jax.numpy as jnp
import numpy as np
from jax import lax
from jax.experimental import pallas as pl
from jax.experimental.pallas import tpu as pltpu


def _round_up(x, m):
    return ((x + m - 1) // m) * m


def _pick_cout_tile(cout_pad, max_tile=512):
    """Largest multiple of 128 that divides cout_pad and is <= max_tile."""
    best, t = 128, 128
    while t <= min(cout_pad, max_tile):
        if cout_pad % t == 0:
            best = t
        t += 128
    return best


# ----------------------------- Pallas kernel --------------------------------
def _conv_bn_relu_kernel(x_ref, w_ref, b_ref, o_ref, *, k, ho, wo_pad):
    """Implicit-GEMM conv + folded-BN bias + ReLU for one image / Cout tile.

    x_ref: (H, W_pad, Cin)   bf16  input image (batch dim squeezed)
    w_ref: (K, K, Cin, TN)   bf16  conv weights with BN scale folded in
    b_ref: (1, TN)           f32   folded bias = beta + scale*(conv_b - mean)
    o_ref: (Ho*Wo_pad, TN)   f32   output rows (batch dim squeezed)
    """
    cin = x_ref.shape[-1]
    tn = o_ref.shape[-1]
    rows = ho * wo_pad

    x = x_ref[...]                                      # (H, W_pad, Cin) bf16

    # Accumulator starts at the folded bias (no separate epilogue add).
    acc = jnp.broadcast_to(b_ref[...], (rows, tn))      # f32

    # K*K shifted sub-matmuls accumulated in f32. The
    # (Ho, Wo_pad, Cin) -> (Ho*Wo_pad, Cin) reshape is layout-friendly because
    # Wo_pad is a multiple of 8 (sublane-aligned collapse of leading dims).
    for kh in range(k):
        for kw in range(k):
            lhs = x[kh:kh + ho, kw:kw + wo_pad, :].reshape(rows, cin)
            acc = acc + jnp.dot(lhs, w_ref[kh, kw],
                                preferred_element_type=jnp.float32)

    o_ref[...] = jnp.maximum(acc, 0.0).astype(o_ref.dtype)


# ------------------------------- Wrapper -------------------------------------
@functools.partial(jax.jit, static_argnames=("kernel_size",))
def basic_conv2d_forward(x_nchw, conv_w, conv_b, bn_gamma, bn_beta,
                         bn_mean, bn_var, *, kernel_size, eps=1e-5):
    """Matches BasicConv2d.forward in eval mode (running BN statistics)."""
    k = kernel_size
    cout, cin, _, _ = conv_w.shape
    n, _, h, w = x_nchw.shape
    ho, wo = h - k + 1, w - k + 1

    # Activations: NCHW -> NHWC (channels-last), bf16 for the MXU.
    x_nhwc = jnp.transpose(x_nchw, (0, 2, 3, 1)).astype(jnp.bfloat16)

    # Pad W so the output width is a multiple of 8 (only a few extra columns;
    # no patch matrix / M-axis padding anywhere).
    wo_pad = _round_up(wo, 8)
    w_need = wo_pad + k - 1
    if w_need > w:
        x_nhwc = jnp.pad(x_nhwc, ((0, 0), (0, 0), (0, w_need - w), (0, 0)))

    # Fold conv bias + eval-mode BatchNorm into the weights / a bias vector:
    #   y = relu(scale * (conv(x) + b - mean) + beta)
    #     = relu(conv(x; W*scale) + (beta + scale*(b - mean)))
    scale = bn_gamma.astype(jnp.float32) / jnp.sqrt(
        bn_var.astype(jnp.float32) + eps)
    bias = bn_beta.astype(jnp.float32) + scale * (
        conv_b.astype(jnp.float32) - bn_mean.astype(jnp.float32))      # (Cout,)

    cout_pad = _round_up(cout, 128)          # lane-dense (unmasked) stores
    # (Cout, Cin, K, K) -> (K, K, Cin, Cout); fold BN scale in f32, cast bf16.
    w_mat = jnp.transpose(conv_w, (2, 3, 1, 0)).astype(jnp.float32) * scale
    w_mat = jnp.pad(w_mat, ((0, 0), (0, 0), (0, 0), (0, cout_pad - cout)))
    w_mat = w_mat.astype(jnp.bfloat16)
    bias2d = jnp.pad(bias.reshape(1, cout), ((0, 0), (0, cout_pad - cout)))

    # Grid: one image per step (implicit GEMM, no halo logic needed), Cout
    # covered by as few lane-dense tiles as possible.
    tn = _pick_cout_tile(cout_pad)
    grid = (n, cout_pad // tn)

    kernel = functools.partial(_conv_bn_relu_kernel, k=k, ho=ho, wo_pad=wo_pad)

    out_rows = pl.pallas_call(
        kernel,
        out_shape=jax.ShapeDtypeStruct((n, ho * wo_pad, cout_pad), jnp.float32),
        grid_spec=pltpu.PrefetchScalarGridSpec(
            num_scalar_prefetch=0,
            grid=grid,
            in_specs=[
                # whole (padded-W) image for this batch index
                pl.BlockSpec((None, h, w_need, cin), lambda b, j: (b, 0, 0, 0)),
                # full K*K*Cin weights for this Cout tile
                pl.BlockSpec((k, k, cin, tn), lambda b, j: (0, 0, 0, j)),
                # folded bias for this Cout tile
                pl.BlockSpec((1, tn), lambda b, j: (0, j)),
            ],
            out_specs=pl.BlockSpec((None, ho * wo_pad, tn),
                                   lambda b, j: (b, 0, j)),
        ),
        compiler_params=pltpu.CompilerParams(
            dimension_semantics=("parallel", "parallel"),
            vmem_limit_bytes=32 * 1024 * 1024),
    )(x_nhwc, w_mat, bias2d)

    # Strip Cout / width padding; NHWC -> NCHW to match the PyTorch module.
    out = out_rows.reshape(n, ho, wo_pad, cout_pad)[:, :, :wo, :cout]
    return jnp.transpose(out, (0, 3, 1, 2))


# ------------------------------ Reference ------------------------------------
def _reference(x_nchw, conv_w, conv_b, bn_gamma, bn_beta, bn_mean, bn_var,
               kernel_size, eps=1e-5):
    y = lax.conv_general_dilated(
        x_nchw.astype(jnp.float32), conv_w.astype(jnp.float32),
        window_strides=(1, 1), padding="VALID",
        dimension_numbers=("NCHW", "OIHW", "NCHW"))
    y = y + conv_b.reshape(1, -1, 1, 1)
    y = (y - bn_mean.reshape(1, -1, 1, 1)) / jnp.sqrt(
        bn_var.reshape(1, -1, 1, 1) + eps)
    y = y * bn_gamma.reshape(1, -1, 1, 1) + bn_beta.reshape(1, -1, 1, 1)
    return jnp.maximum(y, 0.0)


# --------------------------------- Main ---------------------------------------
if __name__ == "__main__":
    # Shapes consistent with BasicConv2d(input_channels=4, output_channels=8,
    # kernel_size=3).
    N, CIN, H, W = 2, 4, 16, 16
    COUT, K = 8, 3

    key = jax.random.PRNGKey(0)
    kx, kw_, kb, kg, kbt, km, kv = jax.random.split(key, 7)

    x = jax.random.normal(kx, (N, CIN, H, W), dtype=jnp.float32)
    conv_w = jax.random.normal(kw_, (COUT, CIN, K, K), dtype=jnp.float32) * 0.1
    conv_b = jax.random.normal(kb, (COUT,), dtype=jnp.float32) * 0.1
    bn_gamma = jax.random.uniform(kg, (COUT,), minval=0.5, maxval=1.5)
    bn_beta = jax.random.normal(kbt, (COUT,), dtype=jnp.float32) * 0.1
    bn_mean = jax.random.normal(km, (COUT,), dtype=jnp.float32) * 0.1
    bn_var = jax.random.uniform(kv, (COUT,), minval=0.5, maxval=1.5)

    out = basic_conv2d_forward(x, conv_w, conv_b, bn_gamma, bn_beta,
                               bn_mean, bn_var, kernel_size=K)
    out = jax.block_until_ready(out)

    ref = _reference(x, conv_w, conv_b, bn_gamma, bn_beta, bn_mean, bn_var, K)
    # bf16 MXU inputs (f32 accumulation) -> tolerance loosened vs. pure-f32.
    np.testing.assert_allclose(np.asarray(out), np.asarray(ref),
                               rtol=2e-2, atol=2e-2)
    assert out.shape == (N, COUT, H - K + 1, W - K + 1)
    print("KERNEL_OK")
</pallas_src>

<mosaic_0001>
module attributes {stable_mosaic.version = 11 : i64} {
  func.func @_conv_bn_relu_kernel(%arg0: i32, %arg1: i32, %arg2: memref<1x16x18x4xbf16, #tpu.memory_space<vmem>>, %arg3: memref<3x3x4x128xbf16, #tpu.memory_space<vmem>>, %arg4: memref<1x128xf32, #tpu.memory_space<vmem>>, %arg5: memref<1x224x128xf32, #tpu.memory_space<vmem>>) attributes {dimension_semantics = [#tpu.dimension_semantics<parallel>, #tpu.dimension_semantics<parallel>], iteration_bounds = array<i64: 2, 1>, scalar_prefetch = 0 : i64, scratch_operands = 0 : i64, tpu.core_type = #tpu.core_type<tc>, window_params = [{transform_indices = @transform_0, window_bounds = array<i64: 1, 16, 18, 4>}, {transform_indices = @transform_1, window_bounds = array<i64: 3, 3, 4, 128>}, {transform_indices = @transform_2, window_bounds = array<i64: 1, 128>}, {transform_indices = @transform_3, window_bounds = array<i64: 1, 224, 128>}]} {
    %c0 = arith.constant 0 : index
    %c0_0 = arith.constant 0 : index
    %c0_1 = arith.constant 0 : index
    %c0_2 = arith.constant 0 : index
    %0 = vector.load %arg2[%c0, %c0_0, %c0_1, %c0_2] : memref<1x16x18x4xbf16, #tpu.memory_space<vmem>>, vector<1x16x18x4xbf16>
    %1 = vector.shape_cast %0 : vector<1x16x18x4xbf16> to vector<16x18x4xbf16>
    %c0_3 = arith.constant 0 : index
    %c0_4 = arith.constant 0 : index
    %2 = vector.load %arg4[%c0_3, %c0_4] : memref<1x128xf32, #tpu.memory_space<vmem>>, vector<1x128xf32>
    %3 = vector.shape_cast %2 : vector<1x128xf32> to vector<1x128xf32>
    %4 = vector.broadcast %3 : vector<1x128xf32> to vector<224x128xf32>
    %5 = vector.extract_strided_slice %1 {offsets = [0, 0, 0], sizes = [14, 16, 4], strides = [1, 1, 1]} : vector<16x18x4xbf16> to vector<14x16x4xbf16>
    %6 = vector.shape_cast %5 : vector<14x16x4xbf16> to vector<224x4xbf16>
    %c0_5 = arith.constant 0 : index
    %c0_6 = arith.constant 0 : index
    %c0_7 = arith.constant 0 : index
    %c0_8 = arith.constant 0 : index
    %7 = vector.load %arg3[%c0_5, %c0_6, %c0_7, %c0_8] : memref<3x3x4x128xbf16, #tpu.memory_space<vmem>>, vector<1x1x4x128xbf16>
    %8 = vector.shape_cast %7 : vector<1x1x4x128xbf16> to vector<4x128xbf16>
    %cst = arith.constant dense<0.000000e+00> : vector<224x128xf32>
    %9 = tpu.matmul %6, %8, %cst {dimension_numbers = #tpu.dot_dimension_numbers<[1], [0], [0], [1], [0, 0, 1, 1], [], []>} : vector<224x4xbf16>, vector<4x128xbf16>, vector<224x128xf32> -> vector<224x128xf32>
    %10 = arith.addf %4, %9 : vector<224x128xf32>
    %11 = vector.extract_strided_slice %1 {offsets = [0, 1, 0], sizes = [14, 16, 4], strides = [1, 1, 1]} : vector<16x18x4xbf16> to vector<14x16x4xbf16>
    %12 = vector.shape_cast %11 : vector<14x16x4xbf16> to vector<224x4xbf16>
    %c0_9 = arith.constant 0 : index
    %c1 = arith.constant 1 : index
    %c0_10 = arith.constant 0 : index
    %c0_11 = arith.constant 0 : index
    %13 = vector.load %arg3[%c0_9, %c1, %c0_10, %c0_11] : memref<3x3x4x128xbf16, #tpu.memory_space<vmem>>, vector<1x1x4x128xbf16>
    %14 = vector.shape_cast %13 : vector<1x1x4x128xbf16> to vector<4x128xbf16>
    %cst_12 = arith.constant dense<0.000000e+00> : vector<224x128xf32>
    %15 = tpu.matmul %12, %14, %cst_12 {dimension_numbers = #tpu.dot_dimension_numbers<[1], [0], [0], [1], [0, 0, 1, 1], [], []>} : vector<224x4xbf16>, vector<4x128xbf16>, vector<224x128xf32> -> vector<224x128xf32>
    %16 = arith.addf %10, %15 : vector<224x128xf32>
    %17 = vector.extract_strided_slice %1 {offsets = [0, 2, 0], sizes = [14, 16, 4], strides = [1, 1, 1]} : vector<16x18x4xbf16> to vector<14x16x4xbf16>
    %18 = vector.shape_cast %17 : vector<14x16x4xbf16> to vector<224x4xbf16>
    %c0_13 = arith.constant 0 : index
    %c2 = arith.constant 2 : index
    %c0_14 = arith.constant 0 : index
    %c0_15 = arith.constant 0 : index
    %19 = vector.load %arg3[%c0_13, %c2, %c0_14, %c0_15] : memref<3x3x4x128xbf16, #tpu.memory_space<vmem>>, vector<1x1x4x128xbf16>
    %20 = vector.shape_cast %19 : vector<1x1x4x128xbf16> to vector<4x128xbf16>
    %cst_16 = arith.constant dense<0.000000e+00> : vector<224x128xf32>
    %21 = tpu.matmul %18, %20, %cst_16 {dimension_numbers = #tpu.dot_dimension_numbers<[1], [0], [0], [1], [0, 0, 1, 1], [], []>} : vector<224x4xbf16>, vector<4x128xbf16>, vector<224x128xf32> -> vector<224x128xf32>
    %22 = arith.addf %16, %21 : vector<224x128xf32>
    %23 = vector.extract_strided_slice %1 {offsets = [1, 0, 0], sizes = [14, 16, 4], strides = [1, 1, 1]} : vector<16x18x4xbf16> to vector<14x16x4xbf16>
    %24 = vector.shape_cast %23 : vector<14x16x4xbf16> to vector<224x4xbf16>
    %c1_17 = arith.constant 1 : index
    %c0_18 = arith.constant 0 : index
    %c0_19 = arith.constant 0 : index
    %c0_20 = arith.constant 0 : index
    %25 = vector.load %arg3[%c1_17, %c0_18, %c0_19, %c0_20] : memref<3x3x4x128xbf16, #tpu.memory_space<vmem>>, vector<1x1x4x128xbf16>
    %26 = vector.shape_cast %25 : vector<1x1x4x128xbf16> to vector<4x128xbf16>
    %cst_21 = arith.constant dense<0.000000e+00> : vector<224x128xf32>
    %27 = tpu.matmul %24, %26, %cst_21 {dimension_numbers = #tpu.dot_dimension_numbers<[1], [0], [0], [1], [0, 0, 1, 1], [], []>} : vector<224x4xbf16>, vector<4x128xbf16>, vector<224x128xf32> -> vector<224x128xf32>
    %28 = arith.addf %22, %27 : vector<224x128xf32>
    %29 = vector.extract_strided_slice %1 {offsets = [1, 1, 0], sizes = [14, 16, 4], strides = [1, 1, 1]} : vector<16x18x4xbf16> to vector<14x16x4xbf16>
    %30 = vector.shape_cast %29 : vector<14x16x4xbf16> to vector<224x4xbf16>
    %c1_22 = arith.constant 1 : index
    %c1_23 = arith.constant 1 : index
    %c0_24 = arith.constant 0 : index
    %c0_25 = arith.constant 0 : index
    %31 = vector.load %arg3[%c1_22, %c1_23, %c0_24, %c0_25] : memref<3x3x4x128xbf16, #tpu.memory_space<vmem>>, vector<1x1x4x128xbf16>
    %32 = vector.shape_cast %31 : vector<1x1x4x128xbf16> to vector<4x128xbf16>
    %cst_26 = arith.constant dense<0.000000e+00> : vector<224x128xf32>
    %33 = tpu.matmul %30, %32, %cst_26 {dimension_numbers = #tpu.dot_dimension_numbers<[1], [0], [0], [1], [0, 0, 1, 1], [], []>} : vector<224x4xbf16>, vector<4x128xbf16>, vector<224x128xf32> -> vector<224x128xf32>
    %34 = arith.addf %28, %33 : vector<224x128xf32>
    %35 = vector.extract_strided_slice %1 {offsets = [1, 2, 0], sizes = [14, 16, 4], strides = [1, 1, 1]} : vector<16x18x4xbf16> to vector<14x16x4xbf16>
    %36 = vector.shape_cast %35 : vector<14x16x4xbf16> to vector<224x4xbf16>
    %c1_27 = arith.constant 1 : index
    %c2_28 = arith.constant 2 : index
    %c0_29 = arith.constant 0 : index
    %c0_30 = arith.constant 0 : index
    %37 = vector.load %arg3[%c1_27, %c2_28, %c0_29, %c0_30] : memref<3x3x4x128xbf16, #tpu.memory_space<vmem>>, vector<1x1x4x128xbf16>
    %38 = vector.shape_cast %37 : vector<1x1x4x128xbf16> to vector<4x128xbf16>
    %cst_31 = arith.constant dense<0.000000e+00> : vector<224x128xf32>
    %39 = tpu.matmul %36, %38, %cst_31 {dimension_numbers = #tpu.dot_dimension_numbers<[1], [0], [0], [1], [0, 0, 1, 1], [], []>} : vector<224x4xbf16>, vector<4x128xbf16>, vector<224x128xf32> -> vector<224x128xf32>
    %40 = arith.addf %34, %39 : vector<224x128xf32>
    %41 = vector.extract_strided_slice %1 {offsets = [2, 0, 0], sizes = [14, 16, 4], strides = [1, 1, 1]} : vector<16x18x4xbf16> to vector<14x16x4xbf16>
    %42 = vector.shape_cast %41 : vector<14x16x4xbf16> to vector<224x4xbf16>
    %c2_32 = arith.constant 2 : index
    %c0_33 = arith.constant 0 : index
    %c0_34 = arith.constant 0 : index
    %c0_35 = arith.constant 0 : index
    %43 = vector.load %arg3[%c2_32, %c0_33, %c0_34, %c0_35] : memref<3x3x4x128xbf16, #tpu.memory_space<vmem>>, vector<1x1x4x128xbf16>
    %44 = vector.shape_cast %43 : vector<1x1x4x128xbf16> to vector<4x128xbf16>
    %cst_36 = arith.constant dense<0.000000e+00> : vector<224x128xf32>
    %45 = tpu.matmul %42, %44, %cst_36 {dimension_numbers = #tpu.dot_dimension_numbers<[1], [0], [0], [1], [0, 0, 1, 1], [], []>} : vector<224x4xbf16>, vector<4x128xbf16>, vector<224x128xf32> -> vector<224x128xf32>
    %46 = arith.addf %40, %45 : vector<224x128xf32>
    %47 = vector.extract_strided_slice %1 {offsets = [2, 1, 0], sizes = [14, 16, 4], strides = [1, 1, 1]} : vector<16x18x4xbf16> to vector<14x16x4xbf16>
    %48 = vector.shape_cast %47 : vector<14x16x4xbf16> to vector<224x4xbf16>
    %c2_37 = arith.constant 2 : index
    %c1_38 = arith.constant 1 : index
    %c0_39 = arith.constant 0 : index
    %c0_40 = arith.constant 0 : index
    %49 = vector.load %arg3[%c2_37, %c1_38, %c0_39, %c0_40] : memref<3x3x4x128xbf16, #tpu.memory_space<vmem>>, vector<1x1x4x128xbf16>
    %50 = vector.shape_cast %49 : vector<1x1x4x128xbf16> to vector<4x128xbf16>
    %cst_41 = arith.constant dense<0.000000e+00> : vector<224x128xf32>
    %51 = tpu.matmul %48, %50, %cst_41 {dimension_numbers = #tpu.dot_dimension_numbers<[1], [0], [0], [1], [0, 0, 1, 1], [], []>} : vector<224x4xbf16>, vector<4x128xbf16>, vector<224x128xf32> -> vector<224x128xf32>
    %52 = arith.addf %46, %51 : vector<224x128xf32>
    %53 = vector.extract_strided_slice %1 {offsets = [2, 2, 0], sizes = [14, 16, 4], strides = [1, 1, 1]} : vector<16x18x4xbf16> to vector<14x16x4xbf16>
    %54 = vector.shape_cast %53 : vector<14x16x4xbf16> to vector<224x4xbf16>
    %c2_42 = arith.constant 2 : index
    %c2_43 = arith.constant 2 : index
    %c0_44 = arith.constant 0 : index
    %c0_45 = arith.constant 0 : index
    %55 = vector.load %arg3[%c2_42, %c2_43, %c0_44, %c0_45] : memref<3x3x4x128xbf16, #tpu.memory_space<vmem>>, vector<1x1x4x128xbf16>
    %56 = vector.shape_cast %55 : vector<1x1x4x128xbf16> to vector<4x128xbf16>
    %cst_46 = arith.constant dense<0.000000e+00> : vector<224x128xf32>
    %57 = tpu.matmul %54, %56, %cst_46 {dimension_numbers = #tpu.dot_dimension_numbers<[1], [0], [0], [1], [0, 0, 1, 1], [], []>} : vector<224x4xbf16>, vector<4x128xbf16>, vector<224x128xf32> -> vector<224x128xf32>
    %58 = arith.addf %52, %57 : vector<224x128xf32>
    %cst_47 = arith.constant 0.000000e+00 : f32
    %59 = vector.broadcast %cst_47 : f32 to vector<224x128xf32>
    %60 = arith.maximumf %58, %59 : vector<224x128xf32>
    %c0_48 = arith.constant 0 : index
    %c0_49 = arith.constant 0 : index
    %c0_50 = arith.constant 0 : index
    %61 = vector.load %arg5[%c0_48, %c0_49, %c0_50] : memref<1x224x128xf32, #tpu.memory_space<vmem>>, vector<1x224x128xf32>
    %62 = vector.shape_cast %61 : vector<1x224x128xf32> to vector<224x128xf32>
    %63 = vector.shape_cast %60 : vector<224x128xf32> to vector<1x224x128xf32>
    tpu.vector_store %arg5[%c0_48, %c0_49, %c0_50], %63 {strides = array<i32>} : memref<1x224x128xf32, #tpu.memory_space<vmem>>, vector<1x224x128xf32>,
    return
  }
  func.func @transform_0(%arg0: i32, %arg1: i32) -> (i32, i32, i32, i32) {
    %c0_i32 = arith.constant 0 : i32
    %c0_i32_0 = arith.constant 0 : i32
    %c0_i32_1 = arith.constant 0 : i32
    %c0_i32_2 = arith.constant 0 : i32
    return %arg0, %c0_i32, %c0_i32_0, %c0_i32_1 : i32, i32, i32, i32
  }
  func.func @transform_1(%arg0: i32, %arg1: i32) -> (i32, i32, i32, i32) {
    %c0_i32 = arith.constant 0 : i32
    %c0_i32_0 = arith.constant 0 : i32
    %c0_i32_1 = arith.constant 0 : i32
    %c0_i32_2 = arith.constant 0 : i32
    return %c0_i32, %c0_i32_0, %c0_i32_1, %arg1 : i32, i32, i32, i32
  }
  func.func @transform_2(%arg0: i32, %arg1: i32) -> (i32, i32) {
    %c0_i32 = arith.constant 0 : i32
    %c0_i32_0 = arith.constant 0 : i32
    return %c0_i32, %arg1 : i32, i32
  }
  func.func @transform_3(%arg0: i32, %arg1: i32) -> (i32, i32, i32) {
    %c0_i32 = arith.constant 0 : i32
    %c0_i32_0 = arith.constant 0 : i32
    return %arg0, %c0_i32, %arg1 : i32, i32, i32
  }
}

</mosaic_0001>

<bundles_post_ra>
// kernel: basic_conv2d_forward.1
= control target key start
LH: loop header
LB: loop body
LE: loop exit
PB: predicated region body
PF: predicated region fallthrough
CT: control target
= control target key end

     0   :  { %s2610_s12 = smov 0   ;;  %s2612_s13 = smov 0   ;;  %s3689_s0 = inlined_call_operand.vmem [shape: bf16[2,16,18,4], index: 0, kind: input, shape index: {}]   ;;  %s3690_s1 = inlined_call_operand.vmem [shape: bf16[3,3,4,128], index: 1, kind: input, shape index: {}]   ;;  %s3691_s2 = inlined_call_operand.vmem [shape: f32[1,128], index: 2, kind: input, shape index: {}]   ;;  %s3692_s3 = inlined_call_operand.vmem [shape: f32[2,224,128], index: 3, kind: output, shape index: {}]  }
   0x1   :  { %s2614_s14 = smov 0  }
   0x2 LB: > { %s25_s15 = sadd.s32 1, %s2584_s13  ;;  %p2289_p0 = scmp.ge.s32.totalorder %s2588_s14, 1  ;;  %s2588_s14 = sphi %s2614_s14, %s13_s14   ;;  %s2584_s13 = sphi %s2612_s13, %s3765_s13   ;;  %s2580_s12 = sphi %s2610_s12, %s3764_s12  }
   0x3   : > { %p27_p1 = scmp.ge.s32.totalorder %s25_s15, 2  ;;  %p168_p2 = scmp.lt.s32.totalorder %s2588_s14, 3 }
   0x5   : > { %s3767_s15 = smov (%p27_p1, %s25_s15), 0  ;;  %p169_p3 = pnand %p2289_p0, %p168_p2 }
   0x7   : > { %172 = sbr.rel (%p169_p3) target bundleno = 665 (0x299), region = 32 }
   0xc   : > { %v275_v0 = vld [vmem:[%s3690_s1] sm:$0x3]  ;;  %vm389_vm0 = vcmask 1041408   ;;  %p202_p4 = scmp.lt.s32.totalorder %s2580_s12, 1  ;;  %v2391_v2 = vld [vmem:[%s3690_s1 + $0x4] sm:$0x3] }
   0xd   : > { %v391_v1 = vsel %vm389_vm0, %v275_v0, 0  ;;  %v2362_v3 = vld [vmem:[%s3690_s1 + $0x2] sm:$0x3]  ;;  %v1237_v4 = vsel %vm389_vm0, %v2391_v2, 0  ;;  %v2425_v6 = vld [vmem:[%s3690_s1 + $0x8] sm:$0x3] }
   0xe   : > { %2524 = vmatpush.bf16.msra.mxu1 %v391_v1  ;;  %2525 = vmatpush.bf16.msra.mxu2 %v391_v1  ;;  %s3769_s12 = smov (!%p202_p4, %s2580_s12), 1  ;;  %v926_v5 = vsel %vm389_vm0, %v2362_v3, 0  ;;  %v1499_v7 = vsel %vm389_vm0, %v2425_v6, 0  ;;  %vm346_vm1 = vcmask 31744   ;;  %v2406_v12 = vld [vmem:[%s3690_s1 + $0x6] sm:$0x3] }
   0xf   : > { %400 = vmatpush.bf16.msra.mxu0 %v391_v1  ;;  %s2527_s24 = smul.u32 192, %s3769_s12  ;;  %2526 = vmatpush.bf16.msra.mxu3 %v391_v1  ;;  %v1357_v13 = vsel %vm389_vm0, %v2406_v12, 0  ;;  %v2456_v23 = vld [vmem:[%s3690_s1 + $0xc] sm:$0x3]  ;;  %v2475_v26 = vld [vmem:[%s3690_s1 + $0xe] sm:$0x3] }
  0x10   : > { %v1745_v25 = vsel %vm389_vm0, %v2456_v23, 0  ;;  %v2441_v27 = vld [vmem:[%s3690_s1 + $0xa] sm:$0x3]  ;;  %v1887_v29 = vsel %vm389_vm0, %v2475_v26, 0  ;;  %v2491_v31 = vld [vmem:[%s3690_s1 + $0x10] sm:$0x3] }
  0x11   : > { %s2650_s27 = scalar_lea.vmem %s3689_s0, %s2527_s24  ;;  %v1625_v30 = vsel %vm389_vm0, %v2441_v27, 0  ;;  %v2013_v32 = vsel %vm389_vm0, %v2491_v31, 0  ;;  %vm500_vm2 = vsmask.f32 3328  ;;  %vm501_vm3 = vsmask.f32 7440 }
  0x12   : > { %1246 = vmatpush.bf16.msrb.mxu2 %v1237_v4  ;;  %935 = vmatpush.bf16.msrb.mxu1 %v926_v5  ;;  %v2653_v8 = vld [vmem:[%s2650_s27 + $0x30] sm:$0xff]  ;;  %v2656_v9 = vld [vmem:[%s2650_s27 + $0x60] sm:$0xff]  ;;  %v2685_v18 = vld [vmem:[%s2650_s27 + $0x48] sm:$0xff]  ;;  %vm1049_vm4 = vcmask 1042432   ;;  %vm1050_vm5 = vcmask 1046532   ;;  %s2528_s17 = smul.u32 224, %s3769_s12 }
  0x13   : > { %1508 = vmatpush.bf16.msrb.mxu0 %v1499_v7  ;;  %v2508_v10 = vld [vmem:[%s2650_s27] sm:$0xff]  ;;  %2352 = vmatmul.msk.bf16.vlgmr.msra.gmra.mxu1 %vm346_vm1, %v2653_v8  ;;  %v2520_v11 = vld [vmem:[%s2650_s27 + $0x90] sm:$0xff]  ;;  %v2688_v19 = vld [vmem:[%s2650_s27 + $0x78] sm:$0xff] }
  0x14   : > { %2356 = vmatmul.msk.bf16.vlgmr.msra.gmra.mxu2 %vm346_vm1, %v2656_v9  ;;  %2348 = vmatmul.msk.bf16.vlgmr.msra.gmra.mxu0 %vm346_vm1, %v2508_v10  ;;  %v2671_v14 = vld [vmem:[%s2650_s27 + $0x3c] sm:$0xff]  ;;  %v2674_v15 = vld [vmem:[%s2650_s27 + $0x6c] sm:$0xff]  ;;  %v2701_v22 = vld [vmem:[%s2650_s27 + $0x4] sm:$0xf]  ;;  %s3543_s20 = scalar_lea.vmem %s3692_s3, %s2528_s17 }
  0x15   : > { %2360 = vmatmul.msk.bf16.vlgmr.msra.gmra.mxu3 %vm346_vm1, %v2520_v11  ;;  %v2509_v16 = vld [vmem:[%s2650_s27 + $0xc] sm:$0xff]  ;;  %v2521_v17 = vld [vmem:[%s2650_s27 + $0x9c] sm:$0xff]  ;;  %v513_v35 = vshll.u32 %v2701_v22, 16  ;;  %v517_v36 = vshrl.u32 %v2701_v22, 16  ;;  %v225_v41 = vld [vmem:[%s2650_s27 + $0x8] sm:$0x1] }
  0x16   : > { %1366 = vmatpush.bf16.msrb.mxu3 %v1357_v13  ;;  %v2691_v20 = vld [vmem:[%s2650_s27 + $0x18] sm:$0xff]  ;;  %v2694_v21 = vld [vmem:[%s2650_s27] sm:$0xf]  ;;  %v2707_v24 = vld [vmem:[%s2650_s27 + $0xc] sm:$0xf]  ;;  %1754 = vmatpush.bf16.msra.mxu2 %v1745_v25  ;;  %v523_v51 = vshll.u32 %v225_v41, 16 }
  0x17   : > { %v2720_v28 = vld [vmem:[%s2650_s27 + $0x10] sm:$0xf]  ;;  %1634 = vmatpush.bf16.msra.mxu1 %v1625_v30  ;;  %v504_v33 = vshrl.u32 %v2694_v21, 16  ;;  %v507_v34 = vshll.u32 %v2694_v21, 16  ;;  %2022 = vmatpush.bf16.msra.mxu0 %v2013_v32  ;;  %v528_v37 = vshrl.u32 %v2707_v24, 16  ;;  %v531_v38 = vshll.u32 %v2707_v24, 16  ;;  %vm2758_vm6 = vmor %vm500_vm2, %vm501_vm3 }
  0x18   : > { %v537_v39 = vshll.u32 %v2720_v28, 16  ;;  %v541_v40 = vshrl.u32 %v2720_v28, 16  ;;  %v515_v44 = vrot.slane %v513_v35, 5  ;;  %v519_v45 = vrot.slane %v517_v36, 4  ;;  %v2738_v50 = vld [vmem:[%s2650_s27 + $0x14] sm:$0x1]  ;;  %vm2762_vm7 = vmor %vm1049_vm4, %vm1050_vm5 }
  0x19   : > { %v506_v42 = vrot.slane %v504_v33, 4  ;;  %v509_v43 = vrot.slane %v507_v34, 5  ;;  %v530_v46 = vrot.slane %v528_v37, 4  ;;  %v533_v47 = vrot.slane %v531_v38, 5  ;;  %v2741_v52 = vld [vmem:[%s2650_s27 + $0x54] sm:$0xff]  ;;  %v2744_v53 = vld [vmem:[%s2650_s27 + $0x84] sm:$0xff] }
  0x1a   : > { %1896 = vmatpush.bf16.msra.mxu3 %v1887_v29  ;;  %v539_v48 = vrot.slane %v537_v39, 5  ;;  %v543_v49 = vrot.slane %v541_v40, 4  ;;  %v520_v55 = vor.u32 %v519_v45, %v515_v44  ;;  %v1054_v56 = vrot.slane %v2701_v22, 5  ;;  %v2748_v57 = vld [vmem:[%s2650_s27 + $0x24] sm:$0xff]  ;;  %v2769_v10 = vld [vmem:[%s2650_s27 + $0x18] sm:$0xf] }
  0x1b   : > { %v510_v54 = vor.u32 %v509_v43, %v506_v42  ;;  %v534_v58 = vor.u32 %v533_v47, %v530_v46  ;;  %v547_v60 = vshll.u32 %v2738_v50, 16  ;;  %v525_v61 = vrot.slane %v523_v51, 5  ;;  %v2772_v11 = vld [vmem:[%s2650_s27 + $0x1c] sm:$0xf]  ;;  %v231_v39 = vld [vmem:[%s2650_s27 + $0x20] sm:$0x1] }
  0x1c   : > { %v544_v59 = vor.u32 %v543_v49, %v539_v48  ;;  %v521_v63 = vrot.slane %v520_v55, 4  ;;  %v2377_v0 = vrot.slane %v2694_v21, 9  ;;  %v1056_v1 = vrot.slane %v1054_v56, 4  ;;  %v2798_v49 = vld [vmem:[%s2650_s27 + $0x24] sm:$0xf] }
  0x1d   : > { %v511_v62 = vrot.slane %v510_v54, 4  ;;  %v1057_v3 = vrot.slane %v225_v41, 5  ;;  %v535_v4 = vrot.slane %v534_v58, 4  ;;  %v549_v6 = vrot.slane %v547_v60, 5 }
  0x1e   : > { %v545_v5 = vrot.slane %v544_v59, 4  ;;  %v526_v13 = vsel %vm2758_vm6, %v521_v63, %v525_v61  ;;  %v552_v22 = vshrl.u32 %v2769_v10, 16  ;;  %v555_v23 = vshll.u32 %v2769_v10, 16 }
  0x1f   : > { %v516_v12 = vsel %vm2758_vm6, %v511_v62, %v515_v44  ;;  %v540_v21 = vsel %vm2758_vm6, %v535_v4, %v539_v48  ;;  %v561_v25 = vshll.u32 %v2772_v11, 16  ;;  %v565_v26 = vshrl.u32 %v2772_v11, 16 }
  0x20   : > { %v841_v27 = vunpack.c.l.b16 %v516_v12  ;;  %v842_v29 = vunpack.c.l.b16 %v526_v13  ;;  %v843_v32 = vunpack.c.l.b16 %v540_v21  ;;  %v554_v34 = vrot.slane %v552_v22, 4  ;;  %v234_v12 = vld [vmem:[%s2650_s27 + $0x2c] sm:$0x1] }
  0x21   : > { %v557_v35 = vrot.slane %v555_v23, 5  ;;  %v563_v36 = vrot.slane %v561_v25, 5  ;;  %v567_v37 = vrot.slane %v565_v26, 4  ;;  %v1061_v38 = vrot.slane %v2720_v28, 5  ;;  %v2801_v28 = vld [vmem:[%s2650_s27 + $0x28] sm:$0xf] }
  0x22   : > { %v869_v40 = vpack.c.b16 %v842_v29, %v841_v27  ;;  %v571_v45 = vshll.u32 %v231_v39, 16  ;;  %v2378_v46 = vrot.slane %v2707_v24, 9  ;;  %v1064_v48 = vrot.slane %v2738_v50, 5 }
  0x23   : > { %2353 = vmatmul.msk.bf16.gmra.mxu1 %vm346_vm1, %v2671_v14  ;;  %v558_v43 = vor.u32 %v557_v35, %v554_v34  ;;  %v568_v44 = vor.u32 %v567_v37, %v563_v36  ;;  %v1063_v47 = vrot.slane %v1061_v38, 4  ;;  %v579_v58 = vshll.u32 %v2798_v49, 16 }
  0x24   : > { %2357 = vmatmul.msk.bf16.gmra.mxu2 %vm346_vm1, %v2674_v15  ;;  %2349 = vmatmul.msk.bf16.gmra.mxu0 %vm346_vm1, %v2509_v16  ;;  %v573_v55 = vrot.slane %v571_v45, 5  ;;  %v1062_v24 = vsel %vm2762_vm7, %v2378_v46, %v1061_v38  ;;  %v585_v59 = vshll.u32 %v2801_v28, 16  ;;  %v589_v60 = vshrl.u32 %v2801_v28, 16  ;;  %v237_v46 = vld [vmem:[%s2650_s27 + $0x38] sm:$0x1] }
  0x25   : > { %2361 = vmatmul.msk.bf16.gmra.mxu3 %vm346_vm1, %v2521_v17  ;;  %v1058_v17 = vsel %vm2762_vm7, %v1056_v1, %v1057_v3  ;;  %v559_v51 = vrot.slane %v558_v43, 4  ;;  %v569_v54 = vrot.slane %v568_v44, 4  ;;  %v1065_v50 = vsel %vm2762_vm7, %v1063_v47, %v1064_v48 }
  0x26   : > { %v1153_v31 = vunpack.c.l.b16 %v1058_v17  ;;  %v1154_v62 = vunpack.c.l.b16 %v1062_v24  ;;  %v1155_v63 = vunpack.c.l.b16 %v1065_v50  ;;  %v581_v1 = vrot.slane %v579_v58, 5 }
  0x27   : > { %v564_v61 = vsel %vm2758_vm6, %v559_v51, %v563_v36  ;;  %v587_v3 = vrot.slane %v585_v59, 5  ;;  %v591_v4 = vrot.slane %v589_v60, 4  ;;  %v1068_v13 = vrot.slane %v2772_v11, 5 }
  0x28   : > { %v2379_v23 = vrot.slane %v2769_v10, 9  ;;  %v1071_v26 = vrot.slane %v231_v39, 5  ;;  %v1075_v48 = vrot.slane %v2801_v28, 5  ;;  %v619_v24 = vshll.u32 %v237_v46, 16 }
  0x29   : > { %v592_v21 = vor.u32 %v591_v4, %v587_v3  ;;  %v1070_v25 = vrot.slane %v1068_v13, 4  ;;  %v2380_v50 = vrot.slane %v2798_v49, 9  ;;  %v1078_v58 = vrot.slane %v234_v12, 5 }
  0x2a   : > { %v1069_v10 = vsel %vm2762_vm7, %v2379_v23, %v1068_v13  ;;  %v621_v60 = vrot.slane %v619_v24, 5 }
  0x2b   : > { %v593_v11 = vrot.slane %v592_v21, 4  ;;  %v1156_v38 = vunpack.c.l.b16 %v1069_v10 }
  0x33   : > { %2354 = vmatmul.msk.bf16.gmra.mxu1 %vm346_vm1, %v2685_v18 }
  0x34   : > { %2358 = vmatmul.msk.bf16.gmra.mxu2 %vm346_vm1, %v2688_v19  ;;  %2350 = vmatmul.msk.bf16.gmra.mxu0 %vm346_vm1, %v2691_v20 }
  0x35   : > { %2411 = vmatmul.msk.bf16.vlgmr.msrb.gmra.mxu3 %vm346_vm1, %v2509_v16  ;;  %v1055_v16 = vsel %vm2762_vm7, %v2377_v0, %v1054_v56  ;;  %v576_v56 = vshrl.u32 %v2798_v49, 16 }
  0x36   : > { %v1152_v30 = vunpack.c.l.b16 %v1055_v16  ;;  %v2819_v16 = vpack.c.b16 %v1155_v63, %v1154_v62  ;;  %v1076_v62 = vsel %vm2762_vm7, %v2380_v50, %v1075_v48 }
  0x37   : > { %v578_v0 = vrot.slane %v576_v56, 4  ;;  %v1077_v56 = vrot.slane %v1075_v48, 4 }
  0x38   : > { %v1180_v41 = vpack.c.b16 %v1153_v31, %v1152_v30  ;;  %v2832_v30 = vld [vmem:[%s2650_s27 + $0x30] sm:$0xf]  ;;  %v2835_v31 = vld [vmem:[%s2650_s27 + $0x34] sm:$0xf] }
  0x39   : > { %v582_v17 = vor.u32 %v581_v1, %v578_v0  ;;  %v600_v35 = vshrl.u32 %v2832_v30, 16  ;;  %v609_v36 = vshll.u32 %v2835_v31, 16  ;;  %v613_v37 = vshrl.u32 %v2835_v31, 16 }
  0x3a   : > { %v1079_v49 = vsel %vm2762_vm7, %v1077_v56, %v1078_v58  ;;  %v2916_v58 = vld [vmem:[%s2650_s27 + $0x50] sm:$0x1] }
  0x3b   : > { %v583_v27 = vrot.slane %v582_v17, 4  ;;  %v611_v44 = vrot.slane %v609_v36, 5  ;;  %v615_v45 = vrot.slane %v613_v37, 4 }
  0x43   : > { %2355 = vmatmul.msk.bf16.gmra.mxu1 %vm346_vm1, %v2741_v52 }
  0x44   : > { %2359 = vmatmul.msk.bf16.gmra.mxu2 %vm346_vm1, %v2744_v53  ;;  %2351 = vmatmul.msk.bf16.gmra.mxu0 %vm346_vm1, %v2748_v57 }
  0x45   : > { %2412 = vmatmul.msk.bf16.gmra.mxu3 %vm346_vm1, %v2691_v20  ;;  %v550_v20 = vsel %vm2758_vm6, %v545_v5, %v549_v6  ;;  %v845_v5 = vunpack.c.l.b16 %v564_v61  ;;  %v2865_v61 = vld [vmem:[%s2650_s27 + $0x3c] sm:$0xf] }
  0x46   : > { %v844_v33 = vunpack.c.l.b16 %v550_v20  ;;  %v595_v20 = vshll.u32 %v234_v12, 16  ;;  %v624_v1 = vshrl.u32 %v2865_v61, 16 }
  0x48   : > { %v870_v42 = vpack.c.b16 %v844_v33, %v843_v32  ;;  %v597_v29 = vrot.slane %v595_v20, 5  ;;  %v1072_v32 = vsel %vm2762_vm7, %v1070_v25, %v1071_v26  ;;  %v588_v33 = vsel %vm2758_vm6, %v583_v27, %v587_v3  ;;  %v240_v26 = vld [vmem:[%s2650_s27 + $0x44] sm:$0x1] }
  0x49   : > { %v1157_v39 = vunpack.c.l.b16 %v1072_v32  ;;  %v626_v17 = vrot.slane %v624_v1, 4  ;;  %v1082_v25 = vrot.slane %v2835_v31, 5  ;;  %v643_v32 = vshll.u32 %v240_v26, 16  ;;  %v2896_v31 = vld [vmem:[%s2650_s27 + $0x48] sm:$0xf] }
  0x4a   : > { %v598_v34 = vsel %vm2758_vm6, %v593_v11, %v597_v29 }
  0x4b   : > { %v2850_v47 = vpack.c.b16 %v1157_v39, %v1156_v38  ;;  %v645_v38 = vrot.slane %v643_v32, 5 }
  0x53   : > { %2363 = vmatmul.msk.bf16.vlgmr.msrb.gmra.mxu1 %vm346_vm1, %v869_v40  ;;  %v847_v40 = vunpack.c.l.b16 %v588_v33  ;;  %v2381_v33 = vrot.slane %v2832_v30, 9 }
  0x54   : > { %2392 = vmatmul.msk.bf16.vlgmr.msrb.gmra.mxu2 %vm346_vm1, %v1180_v41  ;;  %2426 = vmatmul.msk.bf16.vlgmr.msrb.gmra.mxu0 %vm346_vm1, %v870_v42  ;;  %v848_v41 = vunpack.c.l.b16 %v598_v34  ;;  %v1084_v34 = vrot.slane %v1082_v25, 4 }
  0x55   : > { %2413 = vmatmul.msk.bf16.gmra.mxu3 %vm346_vm1, %v2748_v57  ;;  %v574_v57 = vsel %vm2758_vm6, %v569_v54, %v573_v55  ;;  %v616_v55 = vor.u32 %v615_v45, %v611_v44 }
  0x56   : > { %v846_v6 = vunpack.c.l.b16 %v574_v57  ;;  %v2853_v51 = vpack.c.b16 %v848_v41, %v847_v40  ;;  %v2868_v57 = vld [vmem:[%s2650_s27 + $0x40] sm:$0xf]  ;;  %v648_v40 = vshrl.u32 %v2896_v31, 16  ;;  %v651_v41 = vshll.u32 %v2896_v31, 16 }
  0x57   : > { %v617_v59 = vrot.slane %v616_v55, 4  ;;  %v633_v3 = vshll.u32 %v2868_v57, 16  ;;  %v637_v4 = vshrl.u32 %v2868_v57, 16 }
  0x58   : > { %v2821_v22 = vpack.c.b16 %v846_v6, %v845_v5  ;;  %v1158_v5 = vunpack.c.l.b16 %v1076_v62  ;;  %v1159_v6 = vunpack.c.l.b16 %v1079_v49  ;;  %v650_v48 = vrot.slane %v648_v40, 4 }
  0x59   : > { %v622_v0 = vsel %vm2758_vm6, %v617_v59, %v621_v60  ;;  %v635_v20 = vrot.slane %v633_v3, 5  ;;  %v639_v23 = vrot.slane %v637_v4, 4  ;;  %v1089_v59 = vrot.slane %v2868_v57, 5 }
  0x5a   : > { %v850_v13 = vunpack.c.l.b16 %v622_v0  ;;  %v2884_v27 = vpack.c.b16 %v1159_v6, %v1158_v5  ;;  %v2382_v4 = vrot.slane %v2865_v61, 9  ;;  %v1092_v57 = vrot.slane %v240_v26, 5 }
  0x5b   : > { %v640_v10 = vor.u32 %v639_v23, %v635_v20  ;;  %v1091_v5 = vrot.slane %v1089_v59, 4 }
  0x5d   : > { %v641_v37 = vrot.slane %v640_v10, 4 }
  0x63   : > { %2364 = vmatmul.msk.bf16.gmra.mxu1 %vm346_vm1, %v870_v42  ;;  %v602_v42 = vrot.slane %v600_v35, 4  ;;  %v1085_v35 = vrot.slane %v237_v46, 5 }
  0x64   : > { %2393 = vmatmul.msk.bf16.gmra.mxu2 %vm346_vm1, %v2819_v16  ;;  %2427 = vmatmul.msk.bf16.gmra.mxu0 %vm346_vm1, %v2821_v22 }
  0x65   : > { %2414 = vmatmul.msk.bf16.gmra.mxu3 %vm346_vm1, %v2653_v8  ;;  %v603_v8 = vshll.u32 %v2832_v30, 16  ;;  %v1083_v30 = vsel %vm2762_vm7, %v2381_v33, %v1082_v25  ;;  %v1086_v39 = vsel %vm2762_vm7, %v1084_v34, %v1085_v35  ;;  %v1093_v25 = vsel %vm2762_vm7, %v1091_v5, %v1092_v57 }
  0x66   : > { %v1160_v45 = vunpack.c.l.b16 %v1083_v30  ;;  %v1161_v46 = vunpack.c.l.b16 %v1086_v39  ;;  %v1163_v39 = vunpack.c.l.b16 %v1093_v25  ;;  %v1099_v57 = vrot.slane %v2916_v58, 5  ;;  %v3006_v25 = vld [vmem:[%s2650_s27 + $0x64] sm:$0xf] }
  0x67   : > { %v605_v43 = vrot.slane %v603_v8, 5  ;;  %v2899_v8 = vld [vmem:[%s2650_s27 + $0x4c] sm:$0xf] }
  0x68   : > { %v2924_v60 = vpack.c.b16 %v1161_v46, %v1160_v45  ;;  %v2973_v45 = vld [vmem:[%s2650_s27 + $0x5c] sm:$0x1] }
  0x69   : > { %v606_v54 = vor.u32 %v605_v43, %v602_v42  ;;  %v657_v42 = vshll.u32 %v2899_v8, 16  ;;  %v661_v43 = vshrl.u32 %v2899_v8, 16 }
  0x6b   : > { %v607_v28 = vrot.slane %v606_v54, 4  ;;  %v653_v54 = vrot.slane %v651_v41, 5  ;;  %v659_v55 = vrot.slane %v657_v42, 5  ;;  %v663_v24 = vrot.slane %v661_v43, 4 }
  0x6d   : > { %v612_v63 = vsel %vm2758_vm6, %v607_v28, %v611_v44  ;;  %v2921_v28 = vld [vmem:[%s3691_s2] ss:$0 sm:$0xff]  ;;  %v654_v62 = vor.u32 %v653_v54, %v650_v48  ;;  %v664_v49 = vor.u32 %v663_v24, %v659_v55 }
  0x6e   : > { %v849_v12 = vunpack.c.l.b16 %v612_v63  ;;  %v667_v63 = vshll.u32 %v2916_v58, 16 }
  0x6f   : > { %v655_v6 = vrot.slane %v654_v62, 4  ;;  %v691_v62 = vshll.u32 %v2973_v45, 16 }
  0x70   : > { %v2886_v11 = vpack.c.b16 %v850_v13, %v849_v12  ;;  %v665_v12 = vrot.slane %v664_v49, 4  ;;  %v669_v13 = vrot.slane %v667_v63, 5 }
  0x71   : > { %v660_v26 = vsel %vm2758_vm6, %v655_v6, %v659_v55  ;;  %v1096_v55 = vrot.slane %v2899_v8, 5  ;;  %v2383_v8 = vrot.slane %v2896_v31, 9 }
  0x72   : > { %v853_v40 = vunpack.c.l.b16 %v660_v26 }
  0x73   : > { %2365 = vmatmul.msk.bf16.gmra.mxu1 %vm346_vm1, %v2821_v22  ;;  %v1098_v5 = vrot.slane %v1096_v55, 4  ;;  %v1097_v31 = vsel %vm2762_vm7, %v2383_v8, %v1096_v55 }
  0x74   : > { %2394 = vmatmul.msk.bf16.gmra.mxu2 %vm346_vm1, %v2850_v47  ;;  %2428 = vmatmul.msk.bf16.gmra.mxu0 %vm346_vm1, %v2853_v51 }
  0x75   : > { %2415 = vmatmul.msk.bf16.gmra.mxu3 %vm346_vm1, %v2671_v14  ;;  %v627_v14 = vshll.u32 %v2865_v61, 16  ;;  %v2947_v61 = vld [vmem:[%s2650_s27 + $0x58] sm:$0xf]  ;;  %v1100_v58 = vsel %vm2762_vm7, %v1098_v5, %v1099_v57 }
  0x76   : > { %v681_v34 = vshll.u32 %v2947_v61, 16  ;;  %v685_v35 = vshrl.u32 %v2947_v61, 16 }
  0x77   : > { %v629_v21 = vrot.slane %v627_v14, 5 }
  0x79   : > { %v630_v29 = vor.u32 %v629_v21, %v626_v17  ;;  %v2944_v17 = vld [vmem:[%s2650_s27 + $0x54] sm:$0xf] }
  0x7a   : > { %v672_v32 = vshrl.u32 %v2944_v17, 16  ;;  %v675_v33 = vshll.u32 %v2944_v17, 16 }
  0x7b   : > { %v631_v36 = vrot.slane %v630_v29, 4 }
  0x7c   : > { %v674_v42 = vrot.slane %v672_v32, 4  ;;  %v677_v43 = vrot.slane %v675_v33, 5 }
  0x7d   : > { %v636_v44 = vsel %vm2758_vm6, %v631_v36, %v635_v20  ;;  %v1090_v20 = vsel %vm2762_vm7, %v2382_v4, %v1089_v59 }
  0x7e   : > { %v851_v50 = vunpack.c.l.b16 %v636_v44  ;;  %v1162_v30 = vunpack.c.l.b16 %v1090_v20  ;;  %v683_v44 = vrot.slane %v681_v34, 5 }
  0x80   : > { %v2978_v54 = vpack.c.b16 %v1163_v39, %v1162_v30  ;;  %v705_v39 = vshll.u32 %v3006_v25, 16 }
  0x82   : > { %3716 = vst [vmem:[#allocation4_spill] sm:$0xff] %v2978_v54  ;;  %v707_v55 = vrot.slane %v705_v39, 5 }
  0x83   : > { %2366 = vmatmul.msk.bf16.gmra.mxu1 %vm346_vm1, %v2853_v51 }
  0x84   : > { %2395 = vmatmul.msk.bf16.gmra.mxu2 %vm346_vm1, %v2884_v27  ;;  %2429 = vmatmul.msk.bf16.gmra.mxu0 %vm346_vm1, %v2886_v11 }
  0x85   : > { %2416 = vmatmul.msk.bf16.gmra.mxu3 %vm346_vm1, %v2685_v18  ;;  %v646_v18 = vsel %vm2758_vm6, %v641_v37, %v645_v38 }
  0x86   : > { %v852_v56 = vunpack.c.l.b16 %v646_v18  ;;  %v687_v18 = vrot.slane %v685_v35, 4 }
  0x88   : > { %v2927_v1 = vpack.c.b16 %v852_v56, %v851_v50  ;;  %v678_v56 = vor.u32 %v677_v43, %v674_v42  ;;  %v688_v59 = vor.u32 %v687_v18, %v683_v44  ;;  %v1165_v42 = vunpack.c.l.b16 %v1100_v58 }
  0x8a   : > { %v679_v6 = vrot.slane %v678_v56, 4 }
  0x90   : > { %v422_v0 = vpop.f32.mrf.mxu1 }
  0x91   : > { %v2930_v14 = vadd.f32 %v2921_v28, %v422_v0  ;;  %v2932_v3 = vpop.f32.mrf.mxu0 }
  0x93   : > { %2367 = vmatmul.msk.bf16.gmra.mxu1 %vm346_vm1, %v2886_v11 }
  0x94   : > { %2396 = vmatmul.msk.bf16.gmra.mxu2 %vm346_vm1, %v2924_v60  ;;  %2430 = vmatmul.msk.bf16.gmra.mxu0 %vm346_vm1, %v2927_v1 }
  0x95   : > { %2417 = vmatmul.msk.bf16.gmra.mxu3 %vm346_vm1, %v2741_v52  ;;  %v670_v52 = vsel %vm2758_vm6, %v665_v12, %v669_v13  ;;  %v689_v12 = vrot.slane %v688_v59, 4  ;;  %v693_v13 = vrot.slane %v691_v62, 5  ;;  %v1103_v59 = vrot.slane %v2947_v61, 5  ;;  %v3033_v62 = vld [vmem:[%s2650_s27 + $0x68] sm:$0x1] }
  0x96   : > { %v854_v41 = vunpack.c.l.b16 %v670_v52 }
  0x97   : > { %v442_v21 = vpop.f32.mrf.mxu2 }
  0x98   : > { %v2952_v23 = vadd.f32 %v2921_v28, %v442_v21  ;;  %v424_v29 = vpop.f32.mrf.mxu1  ;;  %v462_v10 = vpop.f32.mrf.mxu3  ;;  %v2981_v50 = vpack.c.b16 %v854_v41, %v853_v40  ;;  %v3003_v21 = vld [vmem:[%s2650_s27 + $0x60] sm:$0xf]  ;;  %v709_v40 = vshrl.u32 %v3006_v25, 16  ;;  %v1164_v41 = vunpack.c.l.b16 %v1097_v31 }
  0x99   : > { %v2965_v36 = vadd.f32 %v2921_v28, %v424_v29  ;;  %v2967_v37 = vpop.f32.mrf.mxu0  ;;  %v2970_v38 = vadd.f32 %v2921_v28, %v462_v10  ;;  %v684_v29 = vsel %vm2758_vm6, %v679_v6, %v683_v44  ;;  %v696_v32 = vshrl.u32 %v3003_v21, 16 }
  0x9a   : > { %3717 = vst [vmem:[#allocation5_spill] sm:$0xff] %v2981_v50  ;;  %v699_v33 = vshll.u32 %v3003_v21, 16  ;;  %v855_v43 = vunpack.c.l.b16 %v684_v29  ;;  %v3038_v8 = vpack.c.b16 %v1165_v42, %v1164_v41  ;;  %v715_v31 = vshll.u32 %v3033_v62, 16 }
  0x9b   : > { %3714 = vst [vmem:[#allocation2_spill] sm:$0xff] %v2970_v38  ;;  %v698_v18 = vrot.slane %v696_v32, 4  ;;  %v1105_v29 = vrot.slane %v1103_v59, 4  ;;  %v3063_v32 = vld [vmem:[%s2650_s27 + $0x70] sm:$0xf]  ;;  %v1110_v38 = vrot.slane %v3006_v25, 5 }
  0x9c   : > { %3722 = vst [vmem:[#allocation10_spill] sm:$0xff] %v3038_v8  ;;  %v1113_v25 = vrot.slane %v3033_v62, 5  ;;  %v3122_v62 = vld [vmem:[%s2650_s27 + $0x7c] sm:$0xf] }
  0x9f   : > { %v444_v46 = vpop.f32.mrf.mxu2 }
  0xa0   : > { %v2976_v48 = vadd.f32 %v2921_v28, %v444_v46  ;;  %v427_v24 = vpop.f32.mrf.mxu1  ;;  %v464_v49 = vpop.f32.mrf.mxu3  ;;  %v701_v46 = vrot.slane %v699_v33, 5 }
  0xa1   : > { %v2985_v63 = vadd.f32 %v2921_v28, %v427_v24  ;;  %v2987_v0 = vpop.f32.mrf.mxu0  ;;  %v2990_v4 = vadd.f32 %v2921_v28, %v464_v49  ;;  %v711_v24 = vrot.slane %v709_v40, 4  ;;  %v717_v40 = vrot.slane %v715_v31, 5 }
  0xa2   : > { %3715 = vst [vmem:[#allocation3_spill] sm:$0xff] %v2976_v48  ;;  %v702_v6 = vor.u32 %v701_v46, %v698_v18  ;;  %v729_v18 = vshll.u32 %v3063_v32, 16  ;;  %v733_v46 = vshrl.u32 %v3063_v32, 16 }
  0xa3   : > { %3718 = vst [vmem:[#allocation6_spill] sm:$0xff] %v2990_v4  ;;  %2368 = vmatmul.msk.bf16.gmra.mxu1 %vm346_vm1, %v2927_v1  ;;  %v712_v61 = vor.u32 %v711_v24, %v707_v55 }
  0xa4   : > { %2397 = vmatmul.msk.bf16.gmra.mxu2 %vm346_vm1, %v2978_v54  ;;  %2431 = vmatmul.msk.bf16.gmra.mxu0 %vm346_vm1, %v2981_v50  ;;  %v703_v33 = vrot.slane %v702_v6, 4 }
  0xa5   : > { %2418 = vmatmul.msk.bf16.gmra.mxu3 %vm346_vm1, %v2656_v9  ;;  %v694_v9 = vsel %vm2758_vm6, %v689_v12, %v693_v13  ;;  %v713_v39 = vrot.slane %v712_v61, 4 }
  0xa6   : > { %v856_v44 = vunpack.c.l.b16 %v694_v9  ;;  %v1106_v9 = vrot.slane %v2973_v45, 5 }
  0xa7   : > { %v447_v20 = vpop.f32.mrf.mxu2  ;;  %v718_v6 = vsel %vm2758_vm6, %v713_v39, %v717_v40 }
  0xa8   : > { %v3009_v26 = vadd.f32 %v2921_v28, %v447_v20  ;;  %v429_v52 = vpop.f32.mrf.mxu1  ;;  %v467_v10 = vpop.f32.mrf.mxu3  ;;  %v3040_v57 = vpack.c.b16 %v856_v44, %v855_v43  ;;  %v1107_v41 = vsel %vm2762_vm7, %v1105_v29, %v1106_v9  ;;  %v731_v29 = vrot.slane %v729_v18, 5 }
  0xa9   : > { %v3022_v34 = vadd.f32 %v2921_v28, %v429_v52  ;;  %v3024_v35 = vpop.f32.mrf.mxu0  ;;  %v3027_v30 = vadd.f32 %v2921_v28, %v467_v10  ;;  %v2384_v52 = vrot.slane %v2944_v17, 9  ;;  %v3058_v10 = vld [vmem:[%s2650_s27 + $0x6c] sm:$0xf]  ;;  %v1167_v61 = vunpack.c.l.b16 %v1107_v41 }
  0xaa   : > { %3719 = vst [vmem:[#allocation7_spill] sm:$0xff] %v3009_v26  ;;  %v720_v42 = vshrl.u32 %v3058_v10, 16  ;;  %v723_v44 = vshll.u32 %v3058_v10, 16  ;;  %v735_v9 = vrot.slane %v733_v46, 4  ;;  %v2385_v46 = vrot.slane %v3003_v21, 9 }
  0xab   : > { %3720 = vst [vmem:[#allocation8_spill] sm:$0xff] %v3027_v30  ;;  %v1104_v45 = vsel %vm2762_vm7, %v2384_v52, %v1103_v59  ;;  %v3090_v30 = vld [vmem:[%s2650_s27 + $0x74] sm:$0x1] }
  0xac   : > { %3723 = vst [vmem:[#allocation11_spill] sm:$0xff] %v3040_v57  ;;  %v722_v31 = vrot.slane %v720_v42, 4  ;;  %v725_v52 = vrot.slane %v723_v44, 5  ;;  %v736_v39 = vor.u32 %v735_v9, %v731_v29  ;;  %v739_v40 = vshll.u32 %v3090_v30, 16 }
  0xaf   : > { %v449_v56 = vpop.f32.mrf.mxu2 }
  0xb0   : > { %v3036_v49 = vadd.f32 %v2921_v28, %v449_v56  ;;  %v432_v5 = vpop.f32.mrf.mxu1  ;;  %v469_v12 = vpop.f32.mrf.mxu3 }
  0xb1   : > { %v3043_v13 = vadd.f32 %v2921_v28, %v432_v5  ;;  %v3045_v20 = vpop.f32.mrf.mxu0  ;;  %v3049_v58 = vadd.f32 %v2921_v28, %v469_v12  ;;  %v708_v5 = vsel %vm2758_vm6, %v703_v33, %v707_v55  ;;  %v1166_v12 = vunpack.c.l.b16 %v1104_v45 }
  0xb2   : > { %3721 = vst [vmem:[#allocation9_spill] sm:$0xff] %v3036_v49  ;;  %v726_v33 = vor.u32 %v725_v52, %v722_v31  ;;  %v1111_v31 = vsel %vm2762_vm7, %v2385_v46, %v1110_v38 }
  0xb3   : > { %3724 = vst [vmem:[#allocation12_spill] sm:$0xff] %v3049_v58  ;;  %2369 = vmatmul.msk.bf16.gmra.mxu1 %vm346_vm1, %v2981_v50  ;;  %v858_v58 = vunpack.c.l.b16 %v718_v6  ;;  %v3092_v4 = vpack.c.b16 %v1167_v61, %v1166_v12  ;;  %v737_v6 = vrot.slane %v736_v39, 4  ;;  %v741_v12 = vrot.slane %v739_v40, 5  ;;  %v3119_v61 = vld [vmem:[%s2650_s27 + $0x78] sm:$0xf] }
  0xb4   : > { %2398 = vmatmul.msk.bf16.gmra.mxu2 %vm346_vm1, %v3038_v8  ;;  %2432 = vmatmul.msk.bf16.gmra.mxu0 %vm346_vm1, %v3040_v57  ;;  %v744_v39 = vshrl.u32 %v3119_v61, 16  ;;  %v753_v40 = vshll.u32 %v3122_v62, 16  ;;  %v3252_v50 = vld [vmem:[%s2650_s27 + $0x98] sm:$0x1] }
  0xb5   : > { %2419 = vmatmul.msk.bf16.gmra.mxu3 %vm346_vm1, %v2674_v15  ;;  %3726 = vst [vmem:[#allocation14_spill] sm:$0xff] %v3092_v4 }
  0xb7   : > { %v452_v17 = vpop.f32.mrf.mxu2 }
  0xb8   : > { %v3073_v43 = vadd.f32 %v2921_v28, %v452_v17  ;;  %v434_v15 = vpop.f32.mrf.mxu1  ;;  %v3078_v24 = vpop.f32.mrf.mxu3  ;;  %v857_v17 = vunpack.c.l.b16 %v708_v5  ;;  %v1112_v5 = vrot.slane %v1110_v38, 4  ;;  %v747_v38 = vshll.u32 %v3119_v61, 16 }
  0xb9   : > { %v3081_v56 = vadd.f32 %v2921_v28, %v434_v15  ;;  %v3083_v59 = vpop.f32.mrf.mxu0 }
  0xba   : > { %3725 = vst [vmem:[#allocation13_spill] sm:$0xff] %v3073_v43  ;;  %v3099_v41 = vpack.c.b16 %v858_v58, %v857_v17  ;;  %v727_v58 = vrot.slane %v726_v33, 4  ;;  %v1114_v9 = vsel %vm2762_vm7, %v1112_v5, %v1113_v25  ;;  %v472_v43 = vadd.f32 %v2921_v28, %v2932_v3 }
  0xbb   : > { %v1169_v5 = vunpack.c.l.b16 %v1114_v9 }
  0xbc   : > { %3728 = vst [vmem:[#allocation16_spill] sm:$0xff] %v3099_v41  ;;  %v732_v17 = vsel %vm2758_vm6, %v727_v58, %v731_v29  ;;  %v1168_v29 = vunpack.c.l.b16 %v1111_v31  ;;  %v1117_v31 = vrot.slane %v3063_v32, 5 }
  0xbd   : > { %v859_v58 = vunpack.c.l.b16 %v732_v17 }
  0xbe   : > { %v1119_v32 = vrot.slane %v1117_v31, 4 }
  0xbf   : > { %v454_v15 = vpop.f32.mrf.mxu2 }
  0xc0   : > { %v3096_v55 = vadd.f32 %v2921_v28, %v454_v15  ;;  %v437_v45 = vpop.f32.mrf.mxu1  ;;  %v3101_v42 = vpop.f32.mrf.mxu3 }
  0xc1   : > { %v3104_v44 = vadd.f32 %v2921_v28, %v437_v45  ;;  %v3106_v18 = vpop.f32.mrf.mxu0  ;;  %v757_v45 = vshrl.u32 %v3122_v62, 16 }
  0xc2   : > { %3727 = vst [vmem:[#allocation15_spill] sm:$0xff] %v3096_v55  ;;  %v3147_v55 = vld [vmem:[%s2650_s27 + $0x80] sm:$0x1] }
  0xc3   : > { %2370 = vmatmul.msk.bf16.gmra.mxu1 %vm346_vm1, %v3040_v57 }
  0xc4   : > { %2399 = vmatmul.msk.bf16.gmra.mxu2 %vm346_vm1, %v3092_v4  ;;  %2433 = vmatmul.msk.bf16.gmra.mxu0 %vm346_vm1, %v3099_v41  ;;  %v755_v4 = vrot.slane %v753_v40, 5 }
  0xc5   : > { %2420 = vmatmul.msk.bf16.gmra.mxu3 %vm346_vm1, %v2688_v19  ;;  %v742_v19 = vsel %vm2758_vm6, %v737_v6, %v741_v12  ;;  %v746_v12 = vrot.slane %v744_v39, 4 }
  0xc6   : > { %v860_v6 = vunpack.c.l.b16 %v742_v19 }
  0xc7   : > { %v457_v21 = vpop.f32.mrf.mxu2 }
  0xc8   : > { %v3127_v52 = vadd.f32 %v2921_v28, %v457_v21  ;;  %v439_v15 = vpop.f32.mrf.mxu1  ;;  %v3135_v33 = vpop.f32.mrf.mxu3  ;;  %v749_v21 = vrot.slane %v747_v38, 5  ;;  %v3157_v17 = vpack.c.b16 %v860_v6, %v859_v58  ;;  %v763_v38 = vshll.u32 %v3147_v55, 16 }
  0xc9   : > { %v3142_v25 = vadd.f32 %v2921_v28, %v439_v15  ;;  %v3144_v46 = vpop.f32.mrf.mxu0  ;;  %v3154_v15 = vpack.c.b16 %v1169_v5, %v1168_v29  ;;  %v1120_v29 = vrot.slane %v3090_v30, 5 }
  0xca   : > { %3729 = vst [vmem:[#allocation17_spill] sm:$0xff] %v3127_v52  ;;  %v759_v52 = vrot.slane %v757_v45, 4  ;;  %v750_v19 = vor.u32 %v749_v21, %v746_v12  ;;  %v765_v58 = vrot.slane %v763_v38, 5  ;;  %v3176_v12 = vld [vmem:[%s2650_s27 + $0x88] sm:$0xf] }
  0xcb   : > { %3731 = vst [vmem:[#allocation19_spill] sm:$0xff] %v3154_v15 }
  0xcc   : > { %3732 = vst [vmem:[#allocation20_spill] sm:$0xff] %v3157_v17  ;;  %v760_v39 = vor.u32 %v759_v52, %v755_v4  ;;  %v751_v52 = vrot.slane %v750_v19, 4 }
  0xce   : > { %v761_v5 = vrot.slane %v760_v39, 4  ;;  %v756_v39 = vsel %vm2758_vm6, %v751_v52, %v755_v4 }
  0xcf   : > { %v459_v8 = vpop.f32.mrf.mxu2 }
  0xd0   : > { %v3152_v49 = vadd.f32 %v2921_v28, %v459_v8  ;;  %v937_v9 = vpop.f32.mrf.mxu1  ;;  %v3160_v40 = vpop.f32.mrf.mxu3  ;;  %v2386_v8 = vrot.slane %v3058_v10, 9  ;;  %v473_v10 = vadd.f32 %v2921_v28, %v2967_v37 }
  0xd1   : > { %v1007_v45 = vadd.f32 %v937_v9, %v472_v43  ;;  %v1510_v3 = vpop.f32.mrf.mxu0  ;;  %v3173_v43 = vld [vmem:[%s2650_s27 + $0x84] sm:$0xf]  ;;  %v1121_v9 = vsel %vm2762_vm7, %v1119_v32, %v1120_v29  ;;  %v777_v32 = vshll.u32 %v3176_v12, 16  ;;  %v781_v29 = vshrl.u32 %v3176_v12, 16 }
  0xd2   : > { %3730 = vst [vmem:[#allocation18_spill] sm:$0xff] %v3152_v49  ;;  %v1118_v30 = vsel %vm2762_vm7, %v2386_v8, %v1117_v31  ;;  %v771_v37 = vshll.u32 %v3173_v43, 16  ;;  %v1171_v4 = vunpack.c.l.b16 %v1121_v9 }
  0xd3   : > { %2371 = vmatmul.msk.bf16.gmra.mxu1 %vm346_vm1, %v3099_v41  ;;  %v779_v57 = vrot.slane %v777_v32, 5  ;;  %v783_v54 = vrot.slane %v781_v29, 4 }
  0xd4   : > { %2400 = vmatmul.msk.bf16.gmra.mxu2 %vm346_vm1, %v3154_v15  ;;  %2434 = vmatmul.msk.bf16.gmra.mxu0 %vm346_vm1, %v3157_v17  ;;  %v768_v15 = vshrl.u32 %v3173_v43, 16  ;;  %v773_v41 = vrot.slane %v771_v37, 5 }
  0xd5   : > { %2421 = vmatmul.msk.bf16.gmra.mxu3 %vm346_vm1, %v2744_v53  ;;  %v766_v53 = vsel %vm2758_vm6, %v761_v5, %v765_v58  ;;  %v861_v5 = vunpack.c.l.b16 %v756_v39 }
  0xd6   : > { %v862_v58 = vunpack.c.l.b16 %v766_v53  ;;  %v770_v49 = vrot.slane %v768_v15, 4 }
  0xd7   : > { %v1248_v6 = vpop.f32.mrf.mxu2 }
  0xd8   : > { %v1318_v21 = vadd.f32 %v1248_v6, %v1007_v45  ;;  %v939_v19 = vpop.f32.mrf.mxu1  ;;  %v3188_v38 = vpop.f32.mrf.mxu3  ;;  %v1170_v6 = vunpack.c.l.b16 %v1118_v30  ;;  %v3205_v9 = vpack.c.b16 %v862_v58, %v861_v5  ;;  %v774_v15 = vor.u32 %v773_v41, %v770_v49  ;;  %v3218_v49 = vld [vmem:[%s2650_s27 + $0x90] sm:$0xf] }
  0xd9   : > { %v1008_v31 = vadd.f32 %v939_v19, %v473_v10  ;;  %v1512_v8 = vpop.f32.mrf.mxu0  ;;  %v474_v10 = vadd.f32 %v2921_v28, %v2987_v0  ;;  %v2387_v0 = vrot.slane %v3119_v61, 9  ;;  %v792_v58 = vshrl.u32 %v3218_v49, 16 }
  0xda   : > { %v1438_v45 = vadd.f32 %v3078_v24, %v1318_v21  ;;  %v1124_v24 = vrot.slane %v3122_v62, 5  ;;  %v3199_v21 = vld [vmem:[%s2650_s27 + $0x8c] sm:$0x1]  ;;  %v3203_v30 = vpack.c.b16 %v1171_v4, %v1170_v6  ;;  %v3228_v6 = vld [vmem:[%s2650_s27 + $0x90] sm:$0xff] }
  0xdb   : > { %v787_v32 = vshll.u32 %v3199_v21, 16  ;;  %3736 = vst [vmem:[#allocation24_spill] sm:$0xff] %v3228_v6 }
  0xdc   : > { %v3195_v52 = vadd.f32 %v1510_v3, %v1438_v45  ;;  %3734 = vst [vmem:[#allocation22_spill] sm:$0xff] %v3203_v30  ;;  %v784_v45 = vor.u32 %v783_v54, %v779_v57  ;;  %v3225_v54 = vld [vmem:[%s2650_s27 + $0x94] sm:$0xf] }
  0xdd   : > { %v789_v29 = vrot.slane %v787_v32, 5 }
  0xde   : > { %3733 = vst [vmem:[#allocation21_spill] sm:$0xff] %v3195_v52  ;;  %v785_v61 = vrot.slane %v784_v45, 4 }
  0xdf   : > { %v1250_v26 = vpop.f32.mrf.mxu2 }
  0xe0   : > { %v1319_v19 = vadd.f32 %v1250_v26, %v1008_v31  ;;  %v942_v3 = vpop.f32.mrf.mxu1  ;;  %v3207_v39 = vpop.f32.mrf.mxu3  ;;  %v1126_v26 = vrot.slane %v1124_v24, 4  ;;  %v1127_v31 = vrot.slane %v3147_v55, 5  ;;  %v475_v55 = vadd.f32 %v2921_v28, %v3024_v35 }
  0xe1   : > { %v1009_v37 = vadd.f32 %v942_v3, %v474_v10  ;;  %v1515_v62 = vpop.f32.mrf.mxu0  ;;  %v801_v3 = vshll.u32 %v3225_v54, 16 }
  0xe2   : > { %v1439_v53 = vadd.f32 %v3101_v42, %v1319_v19  ;;  %v775_v42 = vrot.slane %v774_v15, 4  ;;  %v1128_v5 = vsel %vm2762_vm7, %v1126_v26, %v1127_v31  ;;  %v795_v19 = vshll.u32 %v3218_v49, 16 }
  0xe3   : > { %2372 = vmatmul.msk.bf16.gmra.mxu1 %vm346_vm1, %v3157_v17  ;;  %v805_v15 = vshrl.u32 %v3225_v54, 16  ;;  %v1173_v31 = vunpack.c.l.b16 %v1128_v5  ;;  %v811_v5 = vshll.u32 %v3252_v50, 16 }
  0xe4   : > { %2401 = vmatmul.msk.bf16.gmra.mxu2 %vm346_vm1, %v3203_v30  ;;  %v3220_v41 = vadd.f32 %v1512_v8, %v1439_v53  ;;  %2435 = vmatmul.msk.bf16.gmra.mxu0 %vm346_vm1, %v3205_v9  ;;  %v1125_v8 = vsel %vm2762_vm7, %v2387_v0, %v1124_v24  ;;  %v780_v0 = vsel %vm2758_vm6, %v775_v42, %v779_v57  ;;  %v1131_v42 = vrot.slane %v3176_v12, 5 }
  0xe5   : > { %2422 = vmatmul.msk.bf16.gmra.mxu3 %vm346_vm1, %v3228_v6  ;;  %v1172_v26 = vunpack.c.l.b16 %v1125_v8  ;;  %v797_v6 = vrot.slane %v795_v19, 5  ;;  %v807_v52 = vrot.slane %v805_v15, 4  ;;  %v863_v17 = vunpack.c.l.b16 %v780_v0 }
  0xe6   : > { %3735 = vst [vmem:[#allocation23_spill] sm:$0xff] %v3220_v41  ;;  %v803_v41 = vrot.slane %v801_v3, 5  ;;  %v2388_v15 = vrot.slane %v3173_v43, 9  ;;  %v1133_v12 = vrot.slane %v1131_v42, 4  ;;  %v3281_v43 = vld [vmem:[%s2650_s27 + $0x9c] sm:$0xf] }
  0xe7   : > { %v1253_v4 = vpop.f32.mrf.mxu2  ;;  %v3256_v57 = vpack.c.b16 %v1173_v31, %v1172_v26 }
  0xe8   : > { %v1320_v10 = vadd.f32 %v1253_v4, %v1009_v37  ;;  %v944_v53 = vpop.f32.mrf.mxu1  ;;  %v3242_v45 = vpop.f32.mrf.mxu3  ;;  %v790_v37 = vsel %vm2758_vm6, %v785_v61, %v789_v29  ;;  %v794_v4 = vrot.slane %v792_v58, 4  ;;  %v808_v8 = vor.u32 %v807_v52, %v803_v41 }
  0xe9   : > { %v1010_v32 = vadd.f32 %v944_v53, %v475_v55  ;;  %v1517_v24 = vpop.f32.mrf.mxu0  ;;  %v864_v48 = vunpack.c.l.b16 %v790_v37  ;;  %v813_v52 = vrot.slane %v811_v5, 5 }
  0xea   : > { %v1440_v35 = vadd.f32 %v3135_v33, %v1320_v10  ;;  %v476_v33 = vadd.f32 %v2921_v28, %v3045_v20  ;;  %v798_v29 = vor.u32 %v797_v6, %v794_v4  ;;  %v1134_v6 = vrot.slane %v3199_v21, 5  ;;  %v3284_v21 = vld [vmem:[%s2650_s27 + $0xa0] sm:$0xf] }
  0xec   : > { %v3249_v30 = vadd.f32 %v1515_v62, %v1440_v35  ;;  %v3260_v62 = vpack.c.b16 %v864_v48, %v863_v17  ;;  %v799_v48 = vrot.slane %v798_v29, 4  ;;  %v809_v17 = vrot.slane %v808_v8, 4 }
  0xed   : > { %v477_v35 = vadd.f32 %v2921_v28, %v3083_v59  ;;  %v1135_v37 = vsel %vm2762_vm7, %v1133_v12, %v1134_v6  ;;  %v819_v59 = vshll.u32 %v3281_v43, 16 }
  0xee   : > { %v804_v26 = vsel %vm2758_vm6, %v799_v48, %v803_v41  ;;  %v814_v31 = vsel %vm2758_vm6, %v809_v17, %v813_v52  ;;  %v3306_v52 = vld [vmem:[%s2650_s27 + $0xa4] sm:$0x1] }
  0xef   : > { %v1255_v55 = vpop.f32.mrf.mxu2  ;;  %v821_v6 = vrot.slane %v819_v59, 5 }
  0xf0   : > { %v1321_v61 = vadd.f32 %v1255_v55, %v1010_v32  ;;  %v947_v58 = vpop.f32.mrf.mxu1  ;;  %v3262_v10 = vpop.f32.mrf.mxu3  ;;  %v816_v55 = vshrl.u32 %v3281_v43, 16 }
  0xf1   : > { %v1011_v20 = vadd.f32 %v947_v58, %v476_v33  ;;  %v1520_v3 = vpop.f32.mrf.mxu0  ;;  %v1175_v58 = vunpack.c.l.b16 %v1135_v37 }
  0xf2   : > { %v1441_v19 = vadd.f32 %v3160_v40, %v1321_v61  ;;  %v3276_v40 = vld [vmem:[%s2650_s27 + $0x9c] sm:$0xff]  ;;  %v829_v61 = vshrl.u32 %v3284_v21, 16  ;;  %v818_v12 = vrot.slane %v816_v55, 4 }
  0xf3   : > { %2373 = vmatmul.msk.bf16.gmra.mxu1 %vm346_vm1, %v3205_v9  ;;  %3737 = vst [vmem:[#allocation25_spill] sm:$0xff] %v3276_v40 }
  0xf4   : > { %2402 = vmatmul.msk.bf16.gmra.mxu2 %vm346_vm1, %v3256_v57  ;;  %v3271_v53 = vadd.f32 %v1517_v24, %v1441_v19  ;;  %2436 = vmatmul.msk.bf16.gmra.mxu0 %vm346_vm1, %v3260_v62  ;;  %v1132_v24 = vsel %vm2762_vm7, %v2388_v15, %v1131_v42  ;;  %v825_v42 = vshll.u32 %v3284_v21, 16  ;;  %v865_v19 = vunpack.c.l.b16 %v804_v26 }
  0xf5   : > { %2423 = vmatmul.msk.bf16.gmra.mxu3 %vm346_vm1, %v3276_v40  ;;  %v1174_v41 = vunpack.c.l.b16 %v1132_v24  ;;  %v831_v17 = vrot.slane %v829_v61, 4  ;;  %v478_v40 = vadd.f32 %v2921_v28, %v3106_v18  ;;  %v1138_v24 = vrot.slane %v3225_v54, 5 }
  0xf6   : > { %v827_v48 = vrot.slane %v825_v42, 5  ;;  %v3320_v42 = vld [vmem:[%s2650_s27 + $0xa8] sm:$0xff]  ;;  %v2389_v54 = vrot.slane %v3218_v49, 9  ;;  %v479_v49 = vadd.f32 %v2921_v28, %v3144_v46 }
  0xf7   : > { %v1258_v32 = vpop.f32.mrf.mxu2  ;;  %3738 = vst [vmem:[#allocation26_spill] sm:$0xff] %v3320_v42  ;;  %v1140_v61 = vrot.slane %v1138_v24, 4 }
  0xf8   : > { %v1322_v0 = vadd.f32 %v1258_v32, %v1011_v20  ;;  %v949_v4 = vpop.f32.mrf.mxu1  ;;  %v3296_v33 = vpop.f32.mrf.mxu3  ;;  %v866_v20 = vunpack.c.l.b16 %v814_v31  ;;  %v832_v26 = vor.u32 %v831_v17, %v827_v48  ;;  %v835_v31 = vshll.u32 %v3306_v52, 16 }
  0xf9   : > { %v1012_v8 = vadd.f32 %v949_v4, %v477_v35  ;;  %v1522_v5 = vpop.f32.mrf.mxu0  ;;  %v3310_v35 = vpack.c.b16 %v1175_v58, %v1174_v41  ;;  %v3335_v58 = vld [vmem:[%s2650_s27 + $0xa8] sm:$0xf] }
  0xfa   : > { %v1442_v29 = vadd.f32 %v3188_v38, %v1322_v0  ;;  %v3313_v37 = vpack.c.b16 %v866_v20, %v865_v19  ;;  %v837_v41 = vrot.slane %v835_v31, 5  ;;  %v3338_v20 = vld [vmem:[%s2650_s27 + $0xac] sm:$0xf]  ;;  %v1470_v28 = vshll.u32 %v3335_v58, 16 }
  0xfb   : > { %v1480_v31 = vshrl.u32 %v3338_v20, 16 }
  0xfc   : > { %v3303_v15 = vadd.f32 %v1520_v3, %v1442_v29  ;;  %v822_v3 = vor.u32 %v821_v6, %v818_v12  ;;  %v1141_v29 = vrot.slane %v3252_v50, 5 }
  0xfe   : > { %v1142_v12 = vsel %vm2762_vm7, %v1140_v61, %v1141_v29 }
  0xff   : > { %v1260_v32 = vpop.f32.mrf.mxu2 }
 0x100   : > { %v1323_v38 = vadd.f32 %v1260_v32, %v1012_v8  ;;  %v952_v0 = vpop.f32.mrf.mxu1  ;;  %v3316_v4 = vpop.f32.mrf.mxu3 }
 0x101   : > { %v1013_v59 = vadd.f32 %v952_v0, %v478_v40  ;;  %v1525_v18 = vpop.f32.mrf.mxu0  ;;  %v833_v40 = vrot.slane %v832_v26, 4  ;;  %v1467_v0 = vshrl.u32 %v3335_v58, 16  ;;  %v1476_v26 = vshll.u32 %v3338_v20, 16 }
 0x102   : > { %v1443_v55 = vadd.f32 %v3207_v39, %v1323_v38  ;;  %v823_v39 = vrot.slane %v822_v3, 4 }
 0x103   : > { %2374 = vmatmul.msk.bf16.gmra.mxu1 %vm346_vm1, %v3260_v62  ;;  %v838_v32 = vsel %vm2758_vm6, %v833_v40, %v837_v41  ;;  %v1469_v29 = vrot.slane %v1467_v0, 4  ;;  %v1478_v40 = vrot.slane %v1476_v26, 5  ;;  %v1482_v41 = vrot.slane %v1480_v31, 4 }
 0x104   : > { %2403 = vmatmul.msk.bf16.gmra.mxu2 %vm346_vm1, %v3310_v35  ;;  %v3328_v8 = vadd.f32 %v1522_v5, %v1443_v55  ;;  %2437 = vmatmul.msk.bf16.gmra.mxu0 %vm346_vm1, %v3313_v37  ;;  %v1139_v5 = vsel %vm2762_vm7, %v2389_v54, %v1138_v24  ;;  %v828_v17 = vsel %vm2758_vm6, %v823_v39, %v827_v48  ;;  %v1177_v48 = vunpack.c.l.b16 %v1142_v12 }
 0x105   : > { %2424 = vmatmul.msk.bf16.gmra.mxu3 %vm346_vm1, %v3320_v42  ;;  %v1176_v55 = vunpack.c.l.b16 %v1139_v5  ;;  %v867_v54 = vunpack.c.l.b16 %v828_v17  ;;  %v868_v61 = vunpack.c.l.b16 %v838_v32  ;;  %v1472_v39 = vrot.slane %v1470_v28, 5  ;;  %v3360_v42 = vld [vmem:[%s2650_s27 + $0xb0] sm:$0x1] }
 0x106   : > { %v1145_v5 = vrot.slane %v3284_v21, 5  ;;  %v1483_v28 = vor.u32 %v1482_v41, %v1478_v40  ;;  %v2390_v21 = vrot.slane %v3281_v43, 9 }
 0x107   : > { %v1263_v19 = vpop.f32.mrf.mxu2  ;;  %v1473_v12 = vor.u32 %v1472_v39, %v1469_v29 }
 0x108   : > { %v1324_v50 = vadd.f32 %v1263_v19, %v1013_v59  ;;  %v954_v6 = vpop.f32.mrf.mxu1  ;;  %v3350_v38 = vpop.f32.mrf.mxu3  ;;  %v1484_v31 = vrot.slane %v1483_v28, 4 }
 0x109   : > { %v1014_v24 = vadd.f32 %v954_v6, %v479_v49  ;;  %v1527_v3 = vpop.f32.mrf.mxu0  ;;  %v3362_v49 = vpack.c.b16 %v1177_v48, %v1176_v55  ;;  %v3364_v6 = vpack.c.b16 %v868_v61, %v867_v54  ;;  %v1474_v26 = vrot.slane %v1473_v12, 4 }
 0x10a   : > { %v1444_v46 = vadd.f32 %v3242_v45, %v1324_v50 }
 0x10c   : > { %v3357_v59 = vadd.f32 %v1525_v18, %v1444_v46  ;;  %v1486_v46 = vshll.u32 %v3360_v42, 16 }
 0x10e   : > { %v1488_v55 = vrot.slane %v1486_v46, 5 }
 0x10f   : > { %v1265_v19 = vpop.f32.mrf.mxu2 }
 0x110   : > { %v1325_v45 = vadd.f32 %v1265_v19, %v1014_v24  ;;  %v957_v50 = vpop.f32.mrf.mxu1  ;;  %v1395_v18 = vpop.f32.mrf.mxu3  ;;  %v1479_v19 = vsel %vm2758_vm6, %v1474_v26, %v1478_v40 }
 0x111   : > { %v1015_v32 = vadd.f32 %v957_v50, %v2930_v14  ;;  %v1530_v0 = vpop.f32.mrf.mxu0  ;;  %v1148_v14 = vrot.slane %v3306_v52, 5 }
 0x112   : > { %v1445_v17 = vadd.f32 %v3262_v10, %v1325_v45  ;;  %v1147_v10 = vrot.slane %v1145_v5, 4 }
 0x113   : > { %2375 = vmatmul.msk.bf16.gmra.mxu1 %vm346_vm1, %v3313_v37 }
 0x114   : > { %2404 = vmatmul.msk.bf16.gmra.mxu2 %vm346_vm1, %v3362_v49  ;;  %v3374_v24 = vadd.f32 %v1527_v3, %v1445_v17  ;;  %2438 = vmatmul.msk.bf16.gmra.mxu0 %vm346_vm1, %v3364_v6  ;;  %v1146_v3 = vsel %vm2762_vm7, %v2390_v21, %v1145_v5  ;;  %v1149_v29 = vsel %vm2762_vm7, %v1147_v10, %v1148_v14  ;;  %v1492_v5 = vunpack.c.l.b16 %v1479_v19 }
 0x115   : > { %2476 = vmatmul.msk.bf16.vlgmr.msra.gmra.mxu3 %vm346_vm1, %v2821_v22  ;;  %v1489_v22 = vsel %vm2758_vm6, %v1484_v31, %v1488_v55  ;;  %v1178_v45 = vunpack.c.l.b16 %v1146_v3  ;;  %v1179_v50 = vunpack.c.l.b16 %v1149_v29 }
 0x116   : > { %v1493_v17 = vunpack.c.l.b16 %v1489_v22  ;;  %v2556_v22 = vld [vmem:[%s2650_s27 + $0x18] sm:$0xff] }
 0x117   : > { %v1268_v48 = vpop.f32.mrf.mxu2  ;;  %v3394_v46 = vpack.c.b16 %v1179_v50, %v1178_v45 }
 0x118   : > { %v1326_v54 = vadd.f32 %v1268_v48, %v1015_v32  ;;  %v959_v61 = vpop.f32.mrf.mxu1  ;;  %v1398_v39 = vpop.f32.mrf.mxu3  ;;  %v3396_v21 = vpack.c.b16 %v1493_v17, %v1492_v5 }
 0x119   : > { %v1016_v52 = vadd.f32 %v959_v61, %v2965_v36  ;;  %v1532_v41 = vpop.f32.mrf.mxu0 }
 0x11a   : > { %v1446_v43 = vadd.f32 %v3296_v33, %v1326_v54 }
 0x11c   : > { %v3392_v12 = vadd.f32 %v1530_v0, %v1446_v43 }
 0x11f   : > { %v1270_v32 = vpop.f32.mrf.mxu2 }
 0x120   : > { %v1327_v28 = vadd.f32 %v1270_v32, %v1016_v52  ;;  %v962_v33 = vpop.f32.mrf.mxu1  ;;  %v1400_v36 = vpop.f32.mrf.mxu3 }
 0x121   : > { %v1017_v40 = vadd.f32 %v962_v33, %v2985_v63  ;;  %v1535_v14 = vpop.f32.mrf.mxu0 }
 0x122   : > { %v1447_v10 = vadd.f32 %v3316_v4, %v1327_v28 }
 0x123   : > { %2376 = vmatmul.msk.bf16.gmra.mxu1 %vm346_vm1, %v3364_v6 }
 0x124   : > { %2405 = vmatmul.msk.bf16.gmra.mxu2 %vm346_vm1, %v3394_v46  ;;  %v3404_v0 = vadd.f32 %v1532_v41, %v1447_v10  ;;  %2439 = vmatmul.msk.bf16.gmra.mxu0 %vm346_vm1, %v3396_v21 }
 0x125   : > { %2477 = vmatmul.msk.bf16.gmra.mxu3 %vm346_vm1, %v2853_v51 }
 0x127   : > { %v1273_v26 = vpop.f32.mrf.mxu2 }
 0x128   : > { %v1328_v4 = vadd.f32 %v1273_v26, %v1017_v40  ;;  %v964_v31 = vpop.f32.mrf.mxu1  ;;  %v1403_v63 = vpop.f32.mrf.mxu3 }
 0x129   : > { %v1018_v48 = vadd.f32 %v964_v31, %v3022_v34  ;;  %v1537_v54 = vpop.f32.mrf.mxu0 }
 0x12a   : > { %v1448_v55 = vadd.f32 %v3350_v38, %v1328_v4 }
 0x12c   : > { %v3412_v61 = vadd.f32 %v1535_v14, %v1448_v55 }
 0x12f   : > { %v1275_v3 = vpop.f32.mrf.mxu2 }
 0x130   : > { %v1329_v29 = vadd.f32 %v1275_v3, %v1018_v48  ;;  %v967_v43 = vpop.f32.mrf.mxu1  ;;  %v1405_v52 = vpop.f32.mrf.mxu3 }
 0x131   : > { %v1019_v19 = vadd.f32 %v967_v43, %v3043_v13  ;;  %v1540_v51 = vpop.f32.mrf.mxu0 }
 0x132   : > { %v1449_v41 = vadd.f32 %v1395_v18, %v1329_v29 }
 0x133   : > { %2442 = vmatmul.msk.bf16.vlgmr.msra.gmra.mxu1 %vm346_vm1, %v2819_v16 }
 0x134   : > { %2461 = vmatmul.msk.bf16.vlgmr.msra.gmra.mxu2 %vm346_vm1, %v2556_v22  ;;  %v3419_v38 = vadd.f32 %v1537_v54, %v1449_v41  ;;  %2492 = vmatmul.msk.bf16.vlgmr.msra.gmra.mxu0 %vm346_vm1, %v2850_v47 }
 0x135   : > { %2478 = vmatmul.msk.bf16.gmra.mxu3 %vm346_vm1, %v2886_v11  ;;  %v2557_v11 = vld [vmem:[%s2650_s27 + $0x24] sm:$0xff] }
 0x137   : > { %v1278_v34 = vpop.f32.mrf.mxu2 }
 0x138   : > { %v1330_v18 = vadd.f32 %v1278_v34, %v1019_v19  ;;  %v969_v45 = vpop.f32.mrf.mxu1  ;;  %v1408_v13 = vpop.f32.mrf.mxu3 }
 0x139   : > { %v1020_v5 = vadd.f32 %v969_v45, %v3081_v56  ;;  %v1542_v16 = vpop.f32.mrf.mxu0  ;;  %v3740_v45 = vld [vmem:[#allocation3_spill] sm:$0xff] }
 0x13a   : > { %v1450_v50 = vadd.f32 %v1398_v39, %v1330_v18 }
 0x13c   : > { %v3426_v17 = vadd.f32 %v1540_v51, %v1450_v50 }
 0x13f   : > { %v1280_v32 = vpop.f32.mrf.mxu2 }
 0x140   : > { %v1331_v28 = vadd.f32 %v1280_v32, %v1020_v5  ;;  %v972_v33 = vpop.f32.mrf.mxu1  ;;  %v1410_v10 = vpop.f32.mrf.mxu3 }
 0x141   : > { %v1021_v14 = vadd.f32 %v972_v33, %v3104_v44  ;;  %v1545_v26 = vpop.f32.mrf.mxu0 }
 0x142   : > { %v1451_v40 = vadd.f32 %v1400_v36, %v1331_v28 }
 0x143   : > { %2443 = vmatmul.msk.bf16.gmra.mxu1 %vm346_vm1, %v2850_v47 }
 0x144   : > { %2462 = vmatmul.msk.bf16.gmra.mxu2 %vm346_vm1, %v2557_v11  ;;  %v3433_v39 = vadd.f32 %v1542_v16, %v1451_v40  ;;  %2493 = vmatmul.msk.bf16.gmra.mxu0 %vm346_vm1, %v2884_v27 }
 0x145   : > { %2479 = vmatmul.msk.bf16.gmra.mxu3 %vm346_vm1, %v2927_v1  ;;  %v2558_v1 = vld [vmem:[%s2650_s27 + $0x30] sm:$0xff] }
 0x147   : > { %v1283_v56 = vpop.f32.mrf.mxu2 }
 0x148   : > { %v1332_v36 = vadd.f32 %v1283_v56, %v1021_v14  ;;  %v974_v4 = vpop.f32.mrf.mxu1  ;;  %v1413_v44 = vpop.f32.mrf.mxu3  ;;  %v3741_v14 = vld [vmem:[#allocation7_spill] sm:$0xff]  ;;  %v2559_v56 = vld [vmem:[%s2650_s27 + $0x3c] sm:$0xff] }
 0x149   : > { %v1022_v55 = vadd.f32 %v974_v4, %v3142_v25  ;;  %v1547_v47 = vpop.f32.mrf.mxu0  ;;  %v3739_v25 = vld [vmem:[#allocation5_spill] sm:$0xff]  ;;  %v3743_v4 = vld [vmem:[#allocation11_spill] sm:$0xff] }
 0x14a   : > { %v1452_v31 = vadd.f32 %v1403_v63, %v1332_v36  ;;  %v3742_v36 = vld [vmem:[#allocation4_spill] sm:$0xff] }
 0x14c   : > { %v3440_v48 = vadd.f32 %v1545_v26, %v1452_v31 }
 0x14f   : > { %v1285_v54 = vpop.f32.mrf.mxu2 }
 0x150   : > { %v1333_v3 = vadd.f32 %v1285_v54, %v1022_v55  ;;  %v977_v29 = vpop.f32.mrf.mxu1  ;;  %v1415_v43 = vpop.f32.mrf.mxu3 }
 0x151   : > { %v1023_v19 = vadd.f32 %v977_v29, %v2952_v23  ;;  %v1550_v51 = vpop.f32.mrf.mxu0 }
 0x152   : > { %v1453_v41 = vadd.f32 %v1405_v52, %v1333_v3  ;;  %v3744_v3 = vld [vmem:[#allocation9_spill] sm:$0xff] }
 0x153   : > { %2444 = vmatmul.msk.bf16.gmra.mxu1 %vm346_vm1, %v2884_v27 }
 0x154   : > { %2463 = vmatmul.msk.bf16.gmra.mxu2 %vm346_vm1, %v2558_v1  ;;  %v3447_v63 = vadd.f32 %v1547_v47, %v1453_v41  ;;  %2494 = vmatmul.msk.bf16.gmra.mxu0 %vm346_vm1, %v2924_v60 }
 0x155   : > { %2480 = vmatmul.msk.bf16.gmra.mxu3 %vm346_vm1, %v3739_v25 }
 0x157   : > { %v1288_v22 = vpop.f32.mrf.mxu2 }
 0x158   : > { %v1334_v52 = vadd.f32 %v1288_v22, %v1023_v19  ;;  %v979_v34 = vpop.f32.mrf.mxu1  ;;  %v1418_v23 = vpop.f32.mrf.mxu3 }
 0x159   : > { %v1024_v50 = vadd.f32 %v979_v34, %v3740_v45  ;;  %v1552_v27 = vpop.f32.mrf.mxu0  ;;  %v2560_v45 = vld [vmem:[%s2650_s27 + $0x48] sm:$0xff] }
 0x15a   : > { %v1454_v18 = vadd.f32 %v1408_v13, %v1334_v52  ;;  %v3745_v52 = vld [vmem:[#allocation13_spill] sm:$0xff] }
 0x15c   : > { %v3454_v5 = vadd.f32 %v1550_v51, %v1454_v18 }
 0x15f   : > { %v1290_v16 = vpop.f32.mrf.mxu2 }
 0x160   : > { %v1335_v32 = vadd.f32 %v1290_v16, %v1024_v50  ;;  %v982_v28 = vpop.f32.mrf.mxu1  ;;  %v1420_v33 = vpop.f32.mrf.mxu3  ;;  %v3746_v50 = vld [vmem:[#allocation10_spill] sm:$0xff] }
 0x161   : > { %v1025_v26 = vadd.f32 %v982_v28, %v3741_v14  ;;  %v1555_v11 = vpop.f32.mrf.mxu0  ;;  %v3748_v14 = vld [vmem:[#allocation15_spill] sm:$0xff] }
 0x162   : > { %v1455_v40 = vadd.f32 %v1410_v10, %v1335_v32 }
 0x163   : > { %2445 = vmatmul.msk.bf16.gmra.mxu1 %vm346_vm1, %v2924_v60 }
 0x164   : > { %2464 = vmatmul.msk.bf16.gmra.mxu2 %vm346_vm1, %v2559_v56  ;;  %v3461_v13 = vadd.f32 %v1552_v27, %v1455_v40  ;;  %2495 = vmatmul.msk.bf16.gmra.mxu0 %vm346_vm1, %v3742_v36  ;;  %v3747_v27 = vld [vmem:[#allocation16_spill] sm:$0xff] }
 0x165   : > { %2481 = vmatmul.msk.bf16.gmra.mxu3 %vm346_vm1, %v3743_v4 }
 0x167   : > { %v1293_v31 = vpop.f32.mrf.mxu2 }
 0x168   : > { %v1336_v10 = vadd.f32 %v1293_v31, %v1025_v26  ;;  %v984_v55 = vpop.f32.mrf.mxu1  ;;  %v1423_v47 = vpop.f32.mrf.mxu3 }
 0x169   : > { %v1026_v29 = vadd.f32 %v984_v55, %v3744_v3  ;;  %v1557_v60 = vpop.f32.mrf.mxu0 }
 0x16a   : > { %v1456_v54 = vadd.f32 %v1413_v44, %v1336_v10 }
 0x16c   : > { %v3468_v41 = vadd.f32 %v1555_v11, %v1456_v54  ;;  %v3749_v54 = vld [vmem:[#allocation17_spill] sm:$0xff] }
 0x16f   : > { %v1295_v19 = vpop.f32.mrf.mxu2 }
 0x170   : > { %v1337_v51 = vadd.f32 %v1295_v19, %v1026_v29  ;;  %v987_v1 = vpop.f32.mrf.mxu1  ;;  %v1425_v25 = vpop.f32.mrf.mxu3  ;;  %v3750_v19 = vld [vmem:[#allocation14_spill] sm:$0xff] }
 0x171   : > { %v1027_v34 = vadd.f32 %v987_v1, %v3745_v52  ;;  %v1560_v18 = vpop.f32.mrf.mxu0 }
 0x172   : > { %v1457_v22 = vadd.f32 %v1415_v43, %v1337_v51  ;;  %v3751_v51 = vld [vmem:[#allocation20_spill] sm:$0xff] }
 0x173   : > { %2446 = vmatmul.msk.bf16.gmra.mxu1 %vm346_vm1, %v3742_v36 }
 0x174   : > { %2465 = vmatmul.msk.bf16.gmra.mxu2 %vm346_vm1, %v2560_v45  ;;  %v3475_v44 = vadd.f32 %v1557_v60, %v1457_v22  ;;  %2496 = vmatmul.msk.bf16.gmra.mxu0 %vm346_vm1, %v3746_v50  ;;  %v2561_v60 = vld [vmem:[%s2650_s27 + $0x54] sm:$0xff] }
 0x175   : > { %2482 = vmatmul.msk.bf16.gmra.mxu3 %vm346_vm1, %v3747_v27 }
 0x177   : > { %v1298_v16 = vpop.f32.mrf.mxu2 }
 0x178   : > { %v1338_v43 = vadd.f32 %v1298_v16, %v1027_v34  ;;  %v989_v32 = vpop.f32.mrf.mxu1  ;;  %v1428_v28 = vpop.f32.mrf.mxu3 }
 0x179   : > { %v1028_v26 = vadd.f32 %v989_v32, %v3748_v14  ;;  %v1562_v11 = vpop.f32.mrf.mxu0 }
 0x17a   : > { %v1458_v40 = vadd.f32 %v1418_v23, %v1338_v43 }
 0x17c   : > { %v3482_v56 = vadd.f32 %v1560_v18, %v1458_v40  ;;  %v3752_v18 = vld [vmem:[#allocation18_spill] sm:$0xff] }
 0x17f   : > { %v1300_v36 = vpop.f32.mrf.mxu2 }
 0x180   : > { %v1339_v4 = vadd.f32 %v1300_v36, %v1028_v26  ;;  %v992_v31 = vpop.f32.mrf.mxu1  ;;  %v1430_v10 = vpop.f32.mrf.mxu3  ;;  %v3753_v26 = vld [vmem:[#allocation2_spill] sm:$0xff] }
 0x181   : > { %v1029_v3 = vadd.f32 %v992_v31, %v3749_v54  ;;  %v1565_v29 = vpop.f32.mrf.mxu0  ;;  %v3754_v31 = vld [vmem:[#allocation19_spill] sm:$0xff] }
 0x182   : > { %v1459_v55 = vadd.f32 %v1420_v33, %v1339_v4  ;;  %v2562_v4 = vld [vmem:[%s2650_s27 + $0x60] sm:$0xff] }
 0x183   : > { %2447 = vmatmul.msk.bf16.gmra.mxu1 %vm346_vm1, %v3746_v50 }
 0x184   : > { %2466 = vmatmul.msk.bf16.gmra.mxu2 %vm346_vm1, %v2561_v60  ;;  %v3489_v23 = vadd.f32 %v1562_v11, %v1459_v55  ;;  %2497 = vmatmul.msk.bf16.gmra.mxu0 %vm346_vm1, %v3750_v19  ;;  %v3755_v60 = vld [vmem:[#allocation6_spill] sm:$0xff] }
 0x185   : > { %2483 = vmatmul.msk.bf16.gmra.mxu3 %vm346_vm1, %v3751_v51 }
 0x187   : > { %v1303_v1 = vpop.f32.mrf.mxu2 }
 0x188   : > { %v1340_v33 = vadd.f32 %v1303_v1, %v1029_v3  ;;  %v994_v22 = vpop.f32.mrf.mxu1  ;;  %v1433_v52 = vpop.f32.mrf.mxu3 }
 0x189   : > { %v1030_v45 = vadd.f32 %v994_v22, %v3752_v18  ;;  %v1567_v50 = vpop.f32.mrf.mxu0 }
 0x18a   : > { %v1460_v34 = vadd.f32 %v1423_v47, %v1340_v33 }
 0x18c   : > { %v3496_v27 = vadd.f32 %v1565_v29, %v1460_v34 }
 0x18f   : > { %v1305_v16 = vpop.f32.mrf.mxu2 }
 0x190   : > { %v1341_v43 = vadd.f32 %v1305_v16, %v1030_v45  ;;  %v997_v32 = vpop.f32.mrf.mxu1  ;;  %v1435_v40 = vpop.f32.mrf.mxu3 }
 0x191   : > { %v1031_v11 = vadd.f32 %v997_v32, %v3753_v26  ;;  %v1570_v36 = vpop.f32.mrf.mxu0  ;;  %v3757_v32 = vld [vmem:[#allocation22_spill] sm:$0xff] }
 0x192   : > { %v1461_v14 = vadd.f32 %v1425_v25, %v1341_v43 }
 0x193   : > { %2448 = vmatmul.msk.bf16.gmra.mxu1 %vm346_vm1, %v3750_v19 }
 0x194   : > { %2467 = vmatmul.msk.bf16.gmra.mxu2 %vm346_vm1, %v2562_v4  ;;  %v3503_v47 = vadd.f32 %v1567_v50, %v1461_v14  ;;  %2498 = vmatmul.msk.bf16.gmra.mxu0 %vm346_vm1, %v3754_v31  ;;  %v3756_v50 = vld [vmem:[#allocation8_spill] sm:$0xff] }
 0x195   : > { %2484 = vmatmul.msk.bf16.gmra.mxu3 %vm346_vm1, %v3205_v9  ;;  %v2563_v9 = vld [vmem:[%s2650_s27 + $0x6c] sm:$0xff] }
 0x196   : > { %v3758_v4 = vld [vmem:[#allocation12_spill] sm:$0xff] }
 0x197   : > { %v1308_v55 = vpop.f32.mrf.mxu2 }
 0x198   : > { %v1342_v25 = vadd.f32 %v1308_v55, %v1031_v11  ;;  %v999_v54 = vpop.f32.mrf.mxu1  ;;  %v1898_v3 = vpop.f32.mrf.mxu3 }
 0x199   : > { %v1032_v51 = vadd.f32 %v999_v54, %v3755_v60  ;;  %v1572_v19 = vpop.f32.mrf.mxu0 }
 0x19a   : > { %v1462_v29 = vadd.f32 %v1428_v28, %v1342_v25 }
 0x19c   : > { %v3510_v1 = vadd.f32 %v1570_v36, %v1462_v29 }
 0x19f   : > { %v1310_v33 = vpop.f32.mrf.mxu2 }
 0x1a0   : > { %v1343_v22 = vadd.f32 %v1310_v33, %v1032_v51  ;;  %v1002_v34 = vpop.f32.mrf.mxu1  ;;  %v1900_v18 = vpop.f32.mrf.mxu3 }
 0x1a1   : > { %v1033_v16 = vadd.f32 %v1002_v34, %v3756_v50  ;;  %v1575_v43 = vpop.f32.mrf.mxu0 }
 0x1a2   : > { %v1463_v45 = vadd.f32 %v1430_v10, %v1343_v22 }
 0x1a3   : > { %2449 = vmatmul.msk.bf16.gmra.mxu1 %vm346_vm1, %v3754_v31 }
 0x1a4   : > { %2468 = vmatmul.msk.bf16.gmra.mxu2 %vm346_vm1, %v2563_v9  ;;  %v3517_v28 = vadd.f32 %v1572_v19, %v1463_v45  ;;  %2499 = vmatmul.msk.bf16.gmra.mxu0 %vm346_vm1, %v3757_v32 }
 0x1a5   : > { %2485 = vmatmul.msk.bf16.gmra.mxu3 %vm346_vm1, %v3260_v62  ;;  %v2564_v62 = vld [vmem:[%s2650_s27 + $0x78] sm:$0xff] }
 0x1a7   : > { %v1313_v14 = vpop.f32.mrf.mxu2 }
 0x1a8   : > { %v1344_v10 = vadd.f32 %v1313_v14, %v1033_v16  ;;  %v1004_v26 = vpop.f32.mrf.mxu1  ;;  %v1903_v11 = vpop.f32.mrf.mxu3 }
 0x1a9   : > { %v1034_v55 = vadd.f32 %v1004_v26, %v3758_v4  ;;  %v1577_v31 = vpop.f32.mrf.mxu0 }
 0x1aa   : > { %v1464_v36 = vadd.f32 %v1433_v52, %v1344_v10  ;;  %v3759_v52 = vld [vmem:[#allocation21_spill] sm:$0xff]  ;;  %v3760_v10 = vld [vmem:[#allocation23_spill] sm:$0xff] }
 0x1ac   : > { %v3524_v25 = vadd.f32 %v1575_v43, %v1464_v36 }
 0x1af   : > { %v1315_v54 = vpop.f32.mrf.mxu2 }
 0x1b0   : > { %v1345_v29 = vadd.f32 %v1315_v54, %v1034_v55  ;;  %v1636_v60 = vpop.f32.mrf.mxu1  ;;  %v1905_v51 = vpop.f32.mrf.mxu3 }
 0x1b1   : > { %v2024_v33 = vpop.f32.mrf.mxu0  ;;  %v1706_v34 = vadd.f32 %v1636_v60, %v3759_v52 }
 0x1b2   : > { %v1465_v19 = vadd.f32 %v1435_v40, %v1345_v29  ;;  %v2565_v29 = vld [vmem:[%s2650_s27 + $0x84] sm:$0xff] }
 0x1b3   : > { %2450 = vmatmul.msk.bf16.gmra.mxu1 %vm346_vm1, %v3757_v32 }
 0x1b4   : > { %2469 = vmatmul.msk.bf16.gmra.mxu2 %vm346_vm1, %v2564_v62  ;;  %v3530_v22 = vadd.f32 %v1577_v31, %v1465_v19  ;;  %2500 = vmatmul.msk.bf16.gmra.mxu0 %vm346_vm1, %v3256_v57 }
 0x1b5   : > { %2486 = vmatmul.msk.bf16.gmra.mxu3 %vm346_vm1, %v3313_v37 }
 0x1b7   : > { %v1756_v45 = vpop.f32.mrf.mxu2 }
 0x1b8   : > { %v1826_v50 = vadd.f32 %v1756_v45, %v1706_v34  ;;  %v1638_v40 = vpop.f32.mrf.mxu1  ;;  %v3538_v16 = vpop.f32.mrf.mxu3 }
 0x1b9   : > { %v2026_v9 = vpop.f32.mrf.mxu0  ;;  %v1707_v26 = vadd.f32 %v1638_v40, %v3760_v10 }
 0x1ba   : > { %v1968_v43 = vadd.f32 %v1898_v3, %v1826_v50 }
 0x1bc   : > { %v2094_v32 = vadd.f32 %v2024_v33, %v1968_v43 }
 0x1be   : > { %v2122_v14 = vmax.f32 %v2094_v32, 0.0  ;;  %v3567_v32 = vld [vmem:[%s2650_s27 + $0xb8] sm:$0xf] }
 0x1bf   : > { %v1758_v37 = vpop.f32.mrf.mxu2 }
 0x1c0   : > { %2150 = vst [vmem:[%s3543_s20] sm:$0xff] %v2122_v14  ;;  %v1827_v36 = vadd.f32 %v1758_v37, %v1707_v26  ;;  %v1641_v4 = vpop.f32.mrf.mxu1  ;;  %v3547_v55 = vpop.f32.mrf.mxu3 }
 0x1c1   : > { %v2029_v3 = vpop.f32.mrf.mxu0  ;;  %v1708_v19 = vadd.f32 %v1641_v4, %v3249_v30  ;;  %v3564_v30 = vld [vmem:[%s2650_s27 + $0xb4] sm:$0xf] }
 0x1c2   : > { %v1969_v31 = vadd.f32 %v1900_v18, %v1827_v36  ;;  %v1855_v10 = vshrl.u32 %v3564_v30, 16 }
 0x1c3   : > { %2451 = vmatmul.msk.bf16.gmra.mxu1 %vm346_vm1, %v3256_v57 }
 0x1c4   : > { %v2095_v54 = vadd.f32 %v2026_v9, %v1969_v31  ;;  %2470 = vmatmul.msk.bf16.gmra.mxu2 %vm346_vm1, %v2565_v29  ;;  %2501 = vmatmul.msk.bf16.gmra.mxu0 %vm346_vm1, %v3310_v35  ;;  %v1857_v36 = vrot.slane %v1855_v10, 4  ;;  %v1868_v31 = vshrl.u32 %v3567_v32, 16  ;;  %v3580_v29 = vld [vmem:[%s2650_s27 + $0xbc] sm:$0x1] }
 0x1c5   : > { %2487 = vmatmul.msk.bf16.gmra.mxu3 %vm346_vm1, %v3364_v6 }
 0x1c6   : > { %v2123_v60 = vmax.f32 %v2095_v54, 0.0  ;;  %v3761_v54 = vld [vmem:[#allocation24_spill] sm:$0xff] }
 0x1c7   : > { %v1761_v18 = vpop.f32.mrf.mxu2 }
 0x1c8   : > { %2151 = vst [vmem:[%s3543_s20 + $0x8] sm:$0xff] %v2123_v60  ;;  %v1828_v33 = vadd.f32 %v1761_v18, %v1708_v19  ;;  %v1643_v62 = vpop.f32.mrf.mxu1  ;;  %v3559_v57 = vpop.f32.mrf.mxu3  ;;  %v1870_v19 = vrot.slane %v1868_v31, 4  ;;  %v1874_v18 = vshll.u32 %v3580_v29, 16 }
 0x1c9   : > { %v2031_v34 = vpop.f32.mrf.mxu0  ;;  %v1709_v40 = vadd.f32 %v1643_v62, %v3271_v53  ;;  %v1864_v53 = vshll.u32 %v3567_v32, 16 }
 0x1ca   : > { %v1970_v52 = vadd.f32 %v1903_v11, %v1828_v33  ;;  %v1858_v11 = vshll.u32 %v3564_v30, 16 }
 0x1cb   : > { %v1866_v60 = vrot.slane %v1864_v53, 5 }
 0x1cc   : > { %v2096_v45 = vadd.f32 %v2029_v3, %v1970_v52  ;;  %v1860_v4 = vrot.slane %v1858_v11, 5 }
 0x1ce   : > { %v2124_v50 = vmax.f32 %v2096_v45, 0.0  ;;  %v1876_v45 = vrot.slane %v1874_v18, 5 }
 0x1cf   : > { %v1763_v43 = vpop.f32.mrf.mxu2 }
 0x1d0   : > { %2152 = vst [vmem:[%s3543_s20 + $0x10] sm:$0xff] %v2124_v50  ;;  %v1829_v9 = vadd.f32 %v1763_v43, %v1709_v40  ;;  %v1646_v6 = vpop.f32.mrf.mxu1  ;;  %v3569_v14 = vpop.f32.mrf.mxu3 }
 0x1d1   : > { %v2034_v37 = vpop.f32.mrf.mxu0  ;;  %v1710_v62 = vadd.f32 %v1646_v6, %v3303_v15 }
 0x1d2   : > { %v1971_v26 = vadd.f32 %v1905_v51, %v1829_v9  ;;  %v1861_v51 = vor.u32 %v1860_v4, %v1857_v36 }
 0x1d3   : > { %2452 = vmatmul.msk.bf16.gmra.mxu1 %vm346_vm1, %v3310_v35 }
 0x1d4   : > { %v2097_v3 = vadd.f32 %v2031_v34, %v1971_v26  ;;  %2471 = vmatmul.msk.bf16.gmra.mxu2 %vm346_vm1, %v3761_v54  ;;  %2502 = vmatmul.msk.bf16.gmra.mxu0 %vm346_vm1, %v3362_v49  ;;  %v1862_v52 = vrot.slane %v1861_v51, 4  ;;  %v1871_v34 = vor.u32 %v1870_v19, %v1866_v60 }
 0x1d5   : > { %2488 = vmatmul.msk.bf16.gmra.mxu3 %vm346_vm1, %v3396_v21 }
 0x1d6   : > { %v2125_v33 = vmax.f32 %v2097_v3, 0.0  ;;  %v1872_v9 = vrot.slane %v1871_v34, 4  ;;  %v1867_v15 = vsel %vm2758_vm6, %v1862_v52, %v1866_v60  ;;  %v1611_v60 = vrot.slane %v3338_v20, 5 }
 0x1d7   : > { %v1766_v35 = vpop.f32.mrf.mxu2  ;;  %v1880_v4 = vunpack.c.l.b16 %v1867_v15 }
 0x1d8   : > { %2153 = vst [vmem:[%s3543_s20 + $0x18] sm:$0xff] %v2125_v33  ;;  %v1830_v50 = vadd.f32 %v1766_v35, %v1710_v62  ;;  %v1648_v40 = vpop.f32.mrf.mxu1  ;;  %v3589_v43 = vpop.f32.mrf.mxu3  ;;  %v1877_v21 = vsel %vm2758_vm6, %v1872_v9, %v1876_v45  ;;  %v1614_v35 = vrot.slane %v3360_v42, 5 }
 0x1d9   : > { %v2036_v11 = vpop.f32.mrf.mxu0  ;;  %v1711_v36 = vadd.f32 %v1648_v40, %v3328_v8  ;;  %v1881_v53 = vunpack.c.l.b16 %v1877_v21  ;;  %v3762_v8 = vld [vmem:[#allocation25_spill] sm:$0xff] }
 0x1da   : > { %v1972_v10 = vadd.f32 %v3538_v16, %v1830_v50 }
 0x1db   : > { %v1882_v2 = vpack.c.b16 %v1881_v53, %v1880_v4  ;;  %v1999_v53 = vrot.slane %v3567_v32, 5 }
 0x1dc   : > { %v2098_v6 = vadd.f32 %v2034_v37, %v1972_v10  ;;  %v2440_v37 = vrot.slane %v3335_v58, 9 }
 0x1de   : > { %v2126_v26 = vmax.f32 %v2098_v6, 0.0  ;;  %v1612_v58 = vsel %vm2762_vm7, %v2440_v37, %v1611_v60 }
 0x1df   : > { %v1768_v31 = vpop.f32.mrf.mxu2  ;;  %v1618_v9 = vunpack.c.l.b16 %v1612_v58 }
 0x1e0   : > { %2154 = vst [vmem:[%s3543_s20 + $0x20] sm:$0xff] %v2126_v26  ;;  %v1831_v3 = vadd.f32 %v1768_v31, %v1711_v36  ;;  %v1651_v54 = vpop.f32.mrf.mxu1  ;;  %v3598_v51 = vpop.f32.mrf.mxu3 }
 0x1e1   : > { %v2039_v19 = vpop.f32.mrf.mxu0  ;;  %v1712_v62 = vadd.f32 %v1651_v54, %v3357_v59 }
 0x1e2   : > { %v1973_v16 = vadd.f32 %v3547_v55, %v1831_v3  ;;  %v1613_v55 = vrot.slane %v1611_v60, 4  ;;  %v3763_v3 = vld [vmem:[#allocation26_spill] sm:$0xff] }
 0x1e3   : > { %2453 = vmatmul.msk.bf16.gmra.mxu1 %vm346_vm1, %v3362_v49 }
 0x1e4   : > { %v2099_v18 = vadd.f32 %v2036_v11, %v1973_v16  ;;  %2472 = vmatmul.msk.bf16.gmra.mxu2 %vm346_vm1, %v3762_v8  ;;  %2503 = vmatmul.msk.bf16.gmra.mxu0 %vm346_vm1, %v3394_v46  ;;  %v1615_v59 = vsel %vm2762_vm7, %v1613_v55, %v1614_v35 }
 0x1e5   : > { %2489 = vmatmul.msk.bf16.gmra.mxu3 %vm346_vm1, %v1882_v2  ;;  %v1619_v42 = vunpack.c.l.b16 %v1615_v59 }
 0x1e6   : > { %v2127_v33 = vmax.f32 %v2099_v18, 0.0 }
 0x1e7   : > { %v1771_v20 = vpop.f32.mrf.mxu2  ;;  %v1620_v26 = vpack.c.b16 %v1619_v42, %v1618_v9 }
 0x1e8   : > { %2155 = vst [vmem:[%s3543_s20 + $0x28] sm:$0xff] %v2127_v33  ;;  %v1832_v49 = vadd.f32 %v1771_v20, %v1712_v62  ;;  %v1653_v52 = vpop.f32.mrf.mxu1  ;;  %v1923_v34 = vpop.f32.mrf.mxu3 }
 0x1e9   : > { %v2041_v50 = vpop.f32.mrf.mxu0  ;;  %v1713_v11 = vadd.f32 %v1653_v52, %v3374_v24  ;;  %v2490_v24 = vrot.slane %v3564_v30, 9 }
 0x1ea   : > { %v1974_v45 = vadd.f32 %v3559_v57, %v1832_v49  ;;  %v2523_v49 = vld [vmem:[%s2650_s27 + $0xb4] sm:$0xff] }
 0x1eb   : > { %v2000_v8 = vsel %vm2762_vm7, %v2490_v24, %v1999_v53 }
 0x1ec   : > { %v2100_v40 = vadd.f32 %v2039_v19, %v1974_v45  ;;  %v2001_v19 = vrot.slane %v1999_v53, 4  ;;  %v2006_v33 = vunpack.c.l.b16 %v2000_v8 }
 0x1ee   : > { %v2128_v10 = vmax.f32 %v2100_v40, 0.0 }
 0x1ef   : > { %v1773_v15 = vpop.f32.mrf.mxu2 }
 0x1f0   : > { %2156 = vst [vmem:[%s3543_s20 + $0x30] sm:$0xff] %v2128_v10  ;;  %v1833_v21 = vadd.f32 %v1773_v15, %v1713_v11  ;;  %v1656_v6 = vpop.f32.mrf.mxu1  ;;  %v1925_v57 = vpop.f32.mrf.mxu3 }
 0x1f1   : > { %v2044_v4 = vpop.f32.mrf.mxu0  ;;  %v1714_v16 = vadd.f32 %v1656_v6, %v3392_v12 }
 0x1f2   : > { %v1975_v36 = vadd.f32 %v3569_v14, %v1833_v21  ;;  %v2002_v14 = vrot.slane %v3580_v29, 5 }
 0x1f3   : > { %2454 = vmatmul.msk.bf16.gmra.mxu1 %vm346_vm1, %v3394_v46 }
 0x1f4   : > { %v2101_v31 = vadd.f32 %v2041_v50, %v1975_v36  ;;  %2473 = vmatmul.msk.bf16.gmra.mxu2 %vm346_vm1, %v3763_v3  ;;  %2504 = vmatmul.msk.bf16.gmra.mxu0 %vm346_vm1, %v1620_v26  ;;  %v2003_v30 = vsel %vm2762_vm7, %v2001_v19, %v2002_v14 }
 0x1f5   : > { %v2007_v62 = vunpack.c.l.b16 %v2003_v30 }
 0x1f6   : > { %v2129_v54 = vmax.f32 %v2101_v31, 0.0 }
 0x1f7   : > { %v1776_v60 = vpop.f32.mrf.mxu2  ;;  %v2008_v52 = vpack.c.b16 %v2007_v62, %v2006_v33 }
 0x1f8   : > { %2157 = vst [vmem:[%s3543_s20 + $0x38] sm:$0xff] %v2129_v54  ;;  %v1834_v32 = vadd.f32 %v1776_v60, %v1714_v16  ;;  %v1658_v2 = vpop.f32.mrf.mxu1  ;;  %v1928_v37 = vpop.f32.mrf.mxu3 }
 0x1f9   : > { %v2046_v18 = vpop.f32.mrf.mxu0  ;;  %v1715_v55 = vadd.f32 %v1658_v2, %v3404_v0 }
 0x1fa   : > { %v1976_v46 = vadd.f32 %v3589_v43, %v1834_v32 }
 0x1fc   : > { %v2102_v12 = vadd.f32 %v2044_v4, %v1976_v46 }
 0x1fe   : > { %v2130_v29 = vmax.f32 %v2102_v12, 0.0 }
 0x1ff   : > { %v1778_v35 = vpop.f32.mrf.mxu2 }
 0x200   : > { %2158 = vst [vmem:[%s3543_s20 + $0x40] sm:$0xff] %v2130_v29  ;;  %v1835_v20 = vadd.f32 %v1778_v35, %v1715_v55  ;;  %v1661_v43 = vpop.f32.mrf.mxu1  ;;  %v1930_v7 = vpop.f32.mrf.mxu3 }
 0x201   : > { %v2049_v50 = vpop.f32.mrf.mxu0  ;;  %v1716_v59 = vadd.f32 %v1661_v43, %v3412_v61 }
 0x202   : > { %v1977_v45 = vadd.f32 %v3598_v51, %v1835_v20 }
 0x203   : > { %2455 = vmatmul.msk.bf16.gmra.mxu1 %vm346_vm1, %v1620_v26 }
 0x204   : > { %v2103_v58 = vadd.f32 %v2046_v18, %v1977_v45  ;;  %2474 = vmatmul.msk.bf16.gmra.mxu2 %vm346_vm1, %v2523_v49  ;;  %2505 = vmatmul.msk.bf16.gmra.mxu0 %vm346_vm1, %v2008_v52 }
 0x206   : > { %v2131_v0 = vmax.f32 %v2103_v58, 0.0 }
 0x207   : > { %v1781_v40 = vpop.f32.mrf.mxu2 }
 0x208   : > { %2159 = vst [vmem:[%s3543_s20 + $0x48] sm:$0xff] %v2131_v0  ;;  %v1836_v9 = vadd.f32 %v1781_v40, %v1716_v59  ;;  %v1663_v42 = vpop.f32.mrf.mxu1  ;;  %v1933_v26 = vpop.f32.mrf.mxu3 }
 0x209   : > { %v2051_v51 = vpop.f32.mrf.mxu0  ;;  %v1717_v21 = vadd.f32 %v1663_v42, %v3419_v38 }
 0x20a   : > { %v1978_v10 = vadd.f32 %v1923_v34, %v1836_v9 }
 0x20c   : > { %v2104_v11 = vadd.f32 %v2049_v50, %v1978_v10 }
 0x20e   : > { %v2132_v15 = vmax.f32 %v2104_v11, 0.0 }
 0x20f   : > { %v1783_v6 = vpop.f32.mrf.mxu2 }
 0x210   : > { %2160 = vst [vmem:[%s3543_s20 + $0x50] sm:$0xff] %v2132_v15  ;;  %v1837_v36 = vadd.f32 %v1783_v6, %v1717_v21  ;;  %v1666_v4 = vpop.f32.mrf.mxu1  ;;  %v1935_v19 = vpop.f32.mrf.mxu3 }
 0x211   : > { %v2054_v31 = vpop.f32.mrf.mxu0  ;;  %v1718_v24 = vadd.f32 %v1666_v4, %v3426_v17 }
 0x212   : > { %v1979_v53 = vadd.f32 %v1925_v57, %v1837_v36 }
 0x214   : > { %v2105_v61 = vadd.f32 %v2051_v51, %v1979_v53 }
 0x216   : > { %v2133_v3 = vmax.f32 %v2105_v61, 0.0 }
 0x217   : > { %v1786_v54 = vpop.f32.mrf.mxu2 }
 0x218   : > { %2161 = vst [vmem:[%s3543_s20 + $0x58] sm:$0xff] %v2133_v3  ;;  %v1838_v34 = vadd.f32 %v1786_v54, %v1718_v24  ;;  %v1668_v16 = vpop.f32.mrf.mxu1  ;;  %v1938_v17 = vpop.f32.mrf.mxu3 }
 0x219   : > { %v2056_v38 = vpop.f32.mrf.mxu0  ;;  %v1719_v2 = vadd.f32 %v1668_v16, %v3433_v39 }
 0x21a   : > { %v1980_v14 = vadd.f32 %v1928_v37, %v1838_v34 }
 0x21c   : > { %v2106_v60 = vadd.f32 %v2054_v31, %v1980_v14 }
 0x21e   : > { %v2134_v32 = vmax.f32 %v2106_v60, 0.0 }
 0x21f   : > { %v1788_v46 = vpop.f32.mrf.mxu2 }
 0x220   : > { %2162 = vst [vmem:[%s3543_s20 + $0x60] sm:$0xff] %v2134_v32  ;;  %v1839_v57 = vadd.f32 %v1788_v46, %v1719_v2  ;;  %v1671_v18 = vpop.f32.mrf.mxu1  ;;  %v1940_v49 = vpop.f32.mrf.mxu3 }
 0x221   : > { %v2059_v30 = vpop.f32.mrf.mxu0  ;;  %v1720_v62 = vadd.f32 %v1671_v18, %v3440_v48 }
 0x222   : > { %v1981_v8 = vadd.f32 %v1930_v7, %v1839_v57 }
 0x224   : > { %v2107_v12 = vadd.f32 %v2056_v38, %v1981_v8 }
 0x226   : > { %v2135_v33 = vmax.f32 %v2107_v12, 0.0 }
 0x227   : > { %v1791_v29 = vpop.f32.mrf.mxu2 }
 0x228   : > { %2163 = vst [vmem:[%s3543_s20 + $0x68] sm:$0xff] %v2135_v33  ;;  %v1840_v37 = vadd.f32 %v1791_v29, %v1720_v62  ;;  %v1673_v55 = vpop.f32.mrf.mxu1  ;;  %v1943_v42 = vpop.f32.mrf.mxu3 }
 0x229   : > { %v2061_v20 = vpop.f32.mrf.mxu0  ;;  %v1721_v52 = vadd.f32 %v1673_v55, %v3447_v63 }
 0x22a   : > { %v1982_v35 = vadd.f32 %v1933_v26, %v1840_v37 }
 0x22c   : > { %v2108_v39 = vadd.f32 %v2059_v30, %v1982_v35 }
 0x22e   : > { %v2136_v43 = vmax.f32 %v2108_v39, 0.0 }
 0x22f   : > { %v1793_v45 = vpop.f32.mrf.mxu2 }
 0x230   : > { %2164 = vst [vmem:[%s3543_s20 + $0x70] sm:$0xff] %v2136_v43  ;;  %v1841_v50 = vadd.f32 %v1793_v45, %v1721_v52  ;;  %v1676_v58 = vpop.f32.mrf.mxu1  ;;  %v1945_v53 = vpop.f32.mrf.mxu3 }
 0x231   : > { %v2064_v0 = vpop.f32.mrf.mxu0  ;;  %v1722_v40 = vadd.f32 %v1676_v58, %v3454_v5 }
 0x232   : > { %v1983_v7 = vadd.f32 %v1935_v19, %v1841_v50 }
 0x234   : > { %v2109_v48 = vadd.f32 %v2061_v20, %v1983_v7 }
 0x236   : > { %v2137_v59 = vmax.f32 %v2109_v48, 0.0 }
 0x237   : > { %v1796_v9 = vpop.f32.mrf.mxu2 }
 0x238   : > { %2165 = vst [vmem:[%s3543_s20 + $0x78] sm:$0xff] %v2137_v59  ;;  %v1842_v10 = vadd.f32 %v1796_v9, %v1722_v40  ;;  %v1678_v51 = vpop.f32.mrf.mxu1 }
 0x239   : > { %v2066_v15 = vpop.f32.mrf.mxu0  ;;  %v1723_v6 = vadd.f32 %v1678_v51, %v3461_v13  ;;  %v1948_v13 = vpop.f32.mrf.mxu3 }
 0x23a   : > { %v1984_v11 = vadd.f32 %v1938_v17, %v1842_v10 }
 0x23c   : > { %v2110_v63 = vadd.f32 %v2064_v0, %v1984_v11 }
 0x23e   : > { %v2138_v21 = vmax.f32 %v2110_v63, 0.0 }
 0x23f   : > { %v1798_v26 = vpop.f32.mrf.mxu2 }
 0x240   : > { %2166 = vst [vmem:[%s3543_s20 + $0x80] sm:$0xff] %v2138_v21  ;;  %v1843_v36 = vadd.f32 %v1798_v26, %v1723_v6  ;;  %v1681_v4 = vpop.f32.mrf.mxu1 }
 0x241   : > { %v2069_v5 = vpop.f32.mrf.mxu0  ;;  %v1724_v24 = vadd.f32 %v1681_v4, %v3468_v41  ;;  %v1950_v30 = vpop.f32.mrf.mxu3 }
 0x242   : > { %v1985_v31 = vadd.f32 %v1940_v49, %v1843_v36 }
 0x244   : > { %v2111_v61 = vadd.f32 %v2066_v15, %v1985_v31 }
 0x246   : > { %v2139_v3 = vmax.f32 %v2111_v61, 0.0 }
 0x247   : > { %v1801_v54 = vpop.f32.mrf.mxu2 }
 0x248   : > { %2167 = vst [vmem:[%s3543_s20 + $0x88] sm:$0xff] %v2139_v3  ;;  %v1844_v34 = vadd.f32 %v1801_v54, %v1724_v24  ;;  %v1683_v16 = vpop.f32.mrf.mxu1 }
 0x249   : > { %v2071_v14 = vpop.f32.mrf.mxu0  ;;  %v1725_v32 = vadd.f32 %v1683_v16, %v3475_v44  ;;  %v1953_v49 = vpop.f32.mrf.mxu3 }
 0x24a   : > { %v1986_v19 = vadd.f32 %v1943_v42, %v1844_v34 }
 0x24c   : > { %v2112_v38 = vadd.f32 %v2069_v5, %v1986_v19 }
 0x24e   : > { %v2140_v60 = vmax.f32 %v2112_v38, 0.0 }
 0x24f   : > { %v1803_v2 = vpop.f32.mrf.mxu2 }
 0x250   : > { %2168 = vst [vmem:[%s3543_s20 + $0x90] sm:$0xff] %v2140_v60  ;;  %v1845_v46 = vadd.f32 %v1803_v2, %v1725_v32  ;;  %v1686_v57 = vpop.f32.mrf.mxu1 }
 0x251   : > { %v2074_v8 = vpop.f32.mrf.mxu0  ;;  %v1726_v12 = vadd.f32 %v1686_v57, %v3482_v56  ;;  %v1955_v40 = vpop.f32.mrf.mxu3 }
 0x252   : > { %v1987_v18 = vadd.f32 %v1945_v53, %v1845_v46 }
 0x254   : > { %v2113_v41 = vadd.f32 %v2071_v14, %v1987_v18 }
 0x256   : > { %v2141_v17 = vmax.f32 %v2113_v41, 0.0 }
 0x257   : > { %v1806_v33 = vpop.f32.mrf.mxu2 }
 0x258   : > { %2169 = vst [vmem:[%s3543_s20 + $0x98] sm:$0xff] %v2141_v17  ;;  %v1846_v62 = vadd.f32 %v1806_v33, %v1726_v12  ;;  %v1688_v29 = vpop.f32.mrf.mxu1 }
 0x259   : > { %v2076_v55 = vpop.f32.mrf.mxu0  ;;  %v1727_v20 = vadd.f32 %v1688_v29, %v3489_v23  ;;  %v1958_v6 = vpop.f32.mrf.mxu3 }
 0x25a   : > { %v1988_v37 = vadd.f32 %v1948_v13, %v1846_v62 }
 0x25c   : > { %v2114_v44 = vadd.f32 %v2074_v8, %v1988_v37 }
 0x25e   : > { %v2142_v35 = vmax.f32 %v2114_v44, 0.0 }
 0x25f   : > { %v1808_v39 = vpop.f32.mrf.mxu2 }
 0x260   : > { %2170 = vst [vmem:[%s3543_s20 + $0xa0] sm:$0xff] %v2142_v35  ;;  %v1847_v43 = vadd.f32 %v1808_v39, %v1727_v20  ;;  %v1691_v52 = vpop.f32.mrf.mxu1 }
 0x261   : > { %v2079_v50 = vpop.f32.mrf.mxu0  ;;  %v1728_v7 = vadd.f32 %v1691_v52, %v3496_v27 }
 0x262   : > { %v1989_v45 = vadd.f32 %v1950_v30, %v1847_v43 }
 0x264   : > { %v2115_v56 = vadd.f32 %v2076_v55, %v1989_v45 }
 0x266   : > { %v2143_v58 = vmax.f32 %v2115_v56, 0.0 }
 0x267   : > { %v1811_v0 = vpop.f32.mrf.mxu2 }
 0x268   : > { %2171 = vst [vmem:[%s3543_s20 + $0xa8] sm:$0xff] %v2143_v58  ;;  %v1848_v48 = vadd.f32 %v1811_v0, %v1728_v7  ;;  %v1693_v59 = vpop.f32.mrf.mxu1 }
 0x269   : > { %v2081_v23 = vpop.f32.mrf.mxu0  ;;  %v1729_v51 = vadd.f32 %v1693_v59, %v3503_v47  ;;  %v1960_v47 = vpop.f32.mrf.mxu3 }
 0x26a   : > { %v1990_v9 = vadd.f32 %v1953_v49, %v1848_v48 }
 0x26c   : > { %v2116_v42 = vadd.f32 %v2079_v50, %v1990_v9 }
 0x26e   : > { %v2144_v10 = vmax.f32 %v2116_v42, 0.0 }
 0x26f   : > { %v1813_v11 = vpop.f32.mrf.mxu2 }
 0x270   : > { %2172 = vst [vmem:[%s3543_s20 + $0xb0] sm:$0xff] %v2144_v10  ;;  %v1849_v15 = vadd.f32 %v1813_v11, %v1729_v51  ;;  %v1696_v63 = vpop.f32.mrf.mxu1 }
 0x271   : > { %v2084_v26 = vpop.f32.mrf.mxu0  ;;  %v1730_v4 = vadd.f32 %v1696_v63, %v3510_v1  ;;  %v1963_v32 = vpop.f32.mrf.mxu3 }
 0x272   : > { %v1991_v21 = vadd.f32 %v1955_v40, %v1849_v15 }
 0x274   : > { %v2117_v27 = vadd.f32 %v2081_v23, %v1991_v21 }
 0x276   : > { %v2145_v36 = vmax.f32 %v2117_v27, 0.0 }
 0x277   : > { %v1816_v53 = vpop.f32.mrf.mxu2 }
 0x278   : > { %2173 = vst [vmem:[%s3543_s20 + $0xb8] sm:$0xff] %v2145_v36  ;;  %v1850_v31 = vadd.f32 %v1816_v53, %v1730_v4  ;;  %v1698_v5 = vpop.f32.mrf.mxu1 }
 0x279   : > { %v1731_v54 = vadd.f32 %v1698_v5, %v3517_v28  ;;  %v2086_v34 = vpop.f32.mrf.mxu0  ;;  %v1965_v33 = vpop.f32.mrf.mxu3 }
 0x27a   : > { %v1992_v61 = vadd.f32 %v1958_v6, %v1850_v31 }
 0x27c   : > { %v2118_v3 = vadd.f32 %v2084_v26, %v1992_v61 }
 0x27e   : > { %v2146_v24 = vmax.f32 %v2118_v3, 0.0 }
 0x27f   : > { %v1818_v16 = vpop.f32.mrf.mxu2 }
 0x280   : > { %2174 = vst [vmem:[%s3543_s20 + $0xc0] sm:$0xff] %v2146_v24  ;;  %v1851_v19 = vadd.f32 %v1818_v16, %v1731_v54  ;;  %v1701_v14 = vpop.f32.mrf.mxu1 }
 0x281   : > { %v1732_v60 = vadd.f32 %v1701_v14, %v3524_v25  ;;  %v2089_v57 = vpop.f32.mrf.mxu0 }
 0x282   : > { %v1993_v13 = vadd.f32 %v1960_v47, %v1851_v19 }
 0x284   : > { %v2119_v38 = vadd.f32 %v2086_v34, %v1993_v13 }
 0x286   : > { %v2147_v1 = vmax.f32 %v2119_v38, 0.0 }
 0x287   : > { %v1821_v2 = vpop.f32.mrf.mxu2 }
 0x288   : > { %2175 = vst [vmem:[%s3543_s20 + $0xc8] sm:$0xff] %v2147_v1  ;;  %v1852_v46 = vadd.f32 %v1821_v2, %v1732_v60  ;;  %v1703_v8 = vpop.f32.mrf.mxu1 }
 0x289   : > { %v1733_v30 = vadd.f32 %v1703_v8, %v3530_v22  ;;  %v2091_v29 = vpop.f32.mrf.mxu0 }
 0x28a   : > { %v1994_v18 = vadd.f32 %v1963_v32, %v1852_v46 }
 0x28c   : > { %v2120_v28 = vadd.f32 %v2089_v57, %v1994_v18 }
 0x28e   : > { %v2148_v41 = vmax.f32 %v2120_v28, 0.0 }
 0x28f   : > { %v1823_v17 = vpop.f32.mrf.mxu2 }
 0x290   : > { %2176 = vst [vmem:[%s3543_s20 + $0xd0] sm:$0xff] %v2148_v41  ;;  %v1853_v12 = vadd.f32 %v1823_v17, %v1733_v30 }
 0x292   : > { %v1995_v62 = vadd.f32 %v1965_v33, %v1853_v12 }
 0x294   : > { %v2121_v37 = vadd.f32 %v2091_v29, %v1995_v62 }
 0x296   : > { %v2149_v25 = vmax.f32 %v2121_v37, 0.0 }
 0x298   : > { %2177 = vst [vmem:[%s3543_s20 + $0xd8] sm:$0xff] %v2149_v25 }
 0x299 PF: > { %s13_s14 = sadd.s32 1, %s2588_s14   ;;  %s3764_s12 = smov %s2584_s13 }
 0x29a   : > { %p10_p5 = scmp.ge.s32.totalorder %s13_s14, 4   ;;  %s3765_s13 = smov %s3767_s15 }
 0x29c   :  { %12 = sbr.rel (!%p10_p5) target bundleno = 2 (0x2), region = 76 }

</bundles_post_ra>
